<compile_context>
chip_gen: v6e
topology: v6e:2x2x1
jax: 0.10.0
libtpu: 0.0.40
codegen_flags: <defaults>
</compile_context>

<pallas_src>
import jax
import jax.numpy as jnp
from jax.experimental import pallas as pl
from jax.experimental.pallas import tpu as pltpu

# ---- model hyperparameters (small, consistent with the module) --------------
NUM_LAYERS = 2
HIDDEN_SIZE = 32          # spec uses 256; small size for the test harness
INPUT_SIZE = 16           # spec uses 28
NUM_CLASSES = 10
SEQ_LEN = 8               # spec uses 28
BATCH = 2
PAD_BATCH = 8             # batch rows padded to one full sublane group


# -----------------------------------------------------------------------------
# Fused Pallas kernel: LSTM layer 0 || LSTM layer 1 (wavefront) -> FC
# -----------------------------------------------------------------------------
def _fused_lstm_fc_kernel(x_ref,                 # (T*PB, D)   bf16, time-major, 8-row padded
                          wih0_ref, whh0_ref, b0_ref,
                          wih1_ref, whh1_ref, b1_ref,
                          wfc_ref, bfc_ref,
                          out_ref,               # (B, NUM_CLASSES) f32
                          proj0_sc):             # (T*PB, 4H) f32 gate pre-activations
    T, B, PB, H, C = SEQ_LEN, BATCH, PAD_BATCH, HIDDEN_SIZE, NUM_CLASSES
    f32, bf16 = jnp.float32, jnp.bfloat16

    # ---- hoisted layer-0 input projection for all T steps (one MXU call) ----
    proj0_sc[...] = (
        jnp.dot(x_ref[...], wih0_ref[...], preferred_element_type=f32)
        + b0_ref[...]
    )

    # Recurrent / layer-1 weights loaded once (bf16, tiny).
    w_hh0 = whh0_ref[...]
    w_ih1 = wih1_ref[...]
    w_hh1 = whh1_ref[...]
    b1 = b1_ref[...]

    def cell(gates, c):
        # sigmoid via tanh identity: one EUP op over the full 4H vector.
        sg = 0.5 * jnp.tanh(0.5 * gates) + 0.5
        i_g = sg[:, 0 * H:1 * H]
        f_g = sg[:, 1 * H:2 * H]
        o_g = sg[:, 3 * H:4 * H]
        g_g = jnp.tanh(gates[:, 2 * H:3 * H])     # tanh only on the g slice
        c_new = f_g * c + i_g * g_g
        h_new = o_g * jnp.tanh(c_new)
        return h_new, c_new

    zeros = jnp.zeros((PB, H), f32)
    h0, c0 = zeros, zeros
    h1, c1 = zeros, zeros
    proj1_pending = jnp.zeros((PB, 4 * H), f32)   # layer-1 pre-activation for step s-1
    fc_acc = jnp.zeros((PB, C), f32)

    # Wavefront over the time axis: layer-1 consumes step s-1 while layer-0
    # produces step s, so the two recurrent matmuls overlap in the MXU.
    # Fully unrolled static loop (T = 8).
    for s in range(T + 1):
        if s >= 1:
            t = s - 1
            gates1 = proj1_pending + jnp.dot(
                h1.astype(bf16), w_hh1, preferred_element_type=f32)
            h1, c1 = cell(gates1, c1)
            # FC contribution of timestep t: (PB, H) @ (H, C) accumulate.
            fc_acc = fc_acc + jnp.dot(
                h1.astype(bf16), wfc_ref[pl.ds(t * H, H), :],
                preferred_element_type=f32)
        if s < T:
            gates0 = proj0_sc[pl.ds(s * PB, PB), :] + jnp.dot(
                h0.astype(bf16), w_hh0, preferred_element_type=f32)
            h0, c0 = cell(gates0, c0)
            # Layer-1 input projection for step s, computed as soon as h0 exists.
            proj1_pending = jnp.dot(
                h0.astype(bf16), w_ih1, preferred_element_type=f32) + b1

    out_ref[...] = (fc_acc[:B, :] + bfc_ref[...]).astype(out_ref.dtype)


# -----------------------------------------------------------------------------
# Wrapper
# -----------------------------------------------------------------------------
@jax.jit
def rnn_lstm_forward(x, params):
    """x: (B, T, INPUT_SIZE) batch_first, like the PyTorch module."""
    B, T, D = x.shape
    H, PB, C = HIDDEN_SIZE, PAD_BATCH, NUM_CLASSES

    # Time-major, batch padded to one 8-row sublane group so every per-step
    # scratch access in the kernel is an aligned, unmasked tile.
    x_tm = jnp.transpose(x, (1, 0, 2)).astype(jnp.float32)          # (T, B, D)
    x_pad = jnp.zeros((T, PB, D), jnp.float32).at[:, :B, :].set(x_tm)
    x_flat = x_pad.reshape(T * PB, D).astype(jnp.bfloat16)

    p0, p1, fc = params["layer0"], params["layer1"], params["fc"]
    bf16 = jnp.bfloat16

    return pl.pallas_call(
        _fused_lstm_fc_kernel,
        out_shape=jax.ShapeDtypeStruct((B, C), jnp.float32),
        in_specs=[
            pl.BlockSpec((T * PB, D), lambda: (0, 0)),
            pl.BlockSpec((D, 4 * H), lambda: (0, 0)),
            pl.BlockSpec((H, 4 * H), lambda: (0, 0)),
            pl.BlockSpec((1, 4 * H), lambda: (0, 0)),
            pl.BlockSpec((H, 4 * H), lambda: (0, 0)),
            pl.BlockSpec((H, 4 * H), lambda: (0, 0)),
            pl.BlockSpec((1, 4 * H), lambda: (0, 0)),
            pl.BlockSpec((T * H, C), lambda: (0, 0)),
            pl.BlockSpec((1, C), lambda: (0, 0)),
        ],
        out_specs=pl.BlockSpec((B, C), lambda: (0, 0)),
        scratch_shapes=[
            pltpu.VMEM((T * PB, 4 * H), jnp.float32),   # hoisted layer-0 gate pre-acts
        ],
    )(x_flat,
      p0["w_ih_t"].astype(bf16), p0["w_hh_t"].astype(bf16), p0["bias"],
      p1["w_ih_t"].astype(bf16), p1["w_hh_t"].astype(bf16), p1["bias"],
      fc["w_t"].astype(bf16), fc["bias"])


# -----------------------------------------------------------------------------
# Parameter init (deterministic, PyTorch-style uniform(-1/sqrt(H), 1/sqrt(H)))
# -----------------------------------------------------------------------------
def init_params(key):
    params = {}
    bound = 1.0 / jnp.sqrt(HIDDEN_SIZE)
    for l in range(NUM_LAYERS):
        d_in = INPUT_SIZE if l == 0 else HIDDEN_SIZE
        key, k1, k2, k3, k4 = jax.random.split(key, 5)
        w_ih = jax.random.uniform(k1, (4 * HIDDEN_SIZE, d_in),
                                  minval=-bound, maxval=bound)
        w_hh = jax.random.uniform(k2, (4 * HIDDEN_SIZE, HIDDEN_SIZE),
                                  minval=-bound, maxval=bound)
        b_ih = jax.random.uniform(k3, (4 * HIDDEN_SIZE,),
                                  minval=-bound, maxval=bound)
        b_hh = jax.random.uniform(k4, (4 * HIDDEN_SIZE,),
                                  minval=-bound, maxval=bound)
        params[f"layer{l}"] = {
            "w_ih_t": w_ih.T,                                   # (d_in, 4H)
            "w_hh_t": w_hh.T,                                   # (H, 4H)
            "bias": (b_ih + b_hh).reshape(1, 4 * HIDDEN_SIZE),  # (1, 4H)
        }
    fc_in = HIDDEN_SIZE * SEQ_LEN
    fbound = 1.0 / jnp.sqrt(fc_in)
    key, k5, k6 = jax.random.split(key, 3)
    w_fc = jax.random.uniform(k5, (NUM_CLASSES, fc_in),
                              minval=-fbound, maxval=fbound)
    b_fc = jax.random.uniform(k6, (NUM_CLASSES,),
                              minval=-fbound, maxval=fbound)
    params["fc"] = {"w_t": w_fc.T, "bias": b_fc.reshape(1, NUM_CLASSES)}
    return params


# -----------------------------------------------------------------------------
# Pure-JAX reference (f32, for correctness check)
# -----------------------------------------------------------------------------
def reference_forward(x, params):
    x_tm = jnp.transpose(x, (1, 0, 2)).astype(jnp.float32)
    for l in range(NUM_LAYERS):
        p = params[f"layer{l}"]
        H = HIDDEN_SIZE

        def step(carry, x_t, p=p, H=H):
            h, c = carry
            gates = x_t @ p["w_ih_t"] + h @ p["w_hh_t"] + p["bias"][0]
            i = jax.nn.sigmoid(gates[:, 0 * H:1 * H])
            f = jax.nn.sigmoid(gates[:, 1 * H:2 * H])
            g = jnp.tanh(gates[:, 2 * H:3 * H])
            o = jax.nn.sigmoid(gates[:, 3 * H:4 * H])
            c = f * c + i * g
            h = o * jnp.tanh(c)
            return (h, c), h

        B = x_tm.shape[1]
        init = (jnp.zeros((B, H), jnp.float32), jnp.zeros((B, H), jnp.float32))
        _, x_tm = jax.lax.scan(step, init, x_tm)
    out = jnp.transpose(x_tm, (1, 0, 2)).reshape(x.shape[0], -1)
    return out @ params["fc"]["w_t"] + params["fc"]["bias"][0]


# -----------------------------------------------------------------------------
if __name__ == "__main__":
    key = jax.random.PRNGKey(0)
    kx, kp = jax.random.split(key)
    x = jax.random.normal(kx, (BATCH, SEQ_LEN, INPUT_SIZE), dtype=jnp.float32)
    params = init_params(kp)

    out = rnn_lstm_forward(x, params)
    out = jax.block_until_ready(out)

    ref = reference_forward(x, params)
    assert out.shape == (BATCH, NUM_CLASSES), out.shape
    # bf16 MXU operands (f32 accumulation) vs f32 reference -> relaxed tolerance.
    assert jnp.allclose(out, ref, atol=3e-2, rtol=3e-2), (
        "mismatch vs reference: max abs err = "
        f"{jnp.max(jnp.abs(out - ref))}")

    print("KERNEL_OK")
</pallas_src>

<mosaic_0001>
module attributes {stable_mosaic.version = 11 : i64} {
  func.func @_fused_lstm_fc_kernel(%arg0: memref<64x16xbf16, #tpu.memory_space<vmem>>, %arg1: memref<16x128xbf16, #tpu.memory_space<vmem>>, %arg2: memref<32x128xbf16, #tpu.memory_space<vmem>>, %arg3: memref<1x128xf32, #tpu.memory_space<vmem>>, %arg4: memref<32x128xbf16, #tpu.memory_space<vmem>>, %arg5: memref<32x128xbf16, #tpu.memory_space<vmem>>, %arg6: memref<1x128xf32, #tpu.memory_space<vmem>>, %arg7: memref<256x10xbf16, #tpu.memory_space<vmem>>, %arg8: memref<1x10xf32, #tpu.memory_space<vmem>>, %arg9: memref<2x10xf32, #tpu.memory_space<vmem>>, %arg10: memref<64x128xf32, #tpu.memory_space<vmem>>) attributes {dimension_semantics = [], scalar_prefetch = 0 : i64, scratch_operands = 1 : i64, tpu.core_type = #tpu.core_type<tc>} {
    %c0 = arith.constant 0 : index
    %c0_0 = arith.constant 0 : index
    %0 = vector.load %arg0[%c0, %c0_0] : memref<64x16xbf16, #tpu.memory_space<vmem>>, vector<64x16xbf16>
    %c0_1 = arith.constant 0 : index
    %c0_2 = arith.constant 0 : index
    %1 = vector.load %arg1[%c0_1, %c0_2] : memref<16x128xbf16, #tpu.memory_space<vmem>>, vector<16x128xbf16>
    %cst = arith.constant dense<0.000000e+00> : vector<64x128xf32>
    %2 = tpu.matmul %0, %1, %cst {dimension_numbers = #tpu.dot_dimension_numbers<[1], [0], [0], [1], [0, 0, 1, 1], [], []>} : vector<64x16xbf16>, vector<16x128xbf16>, vector<64x128xf32> -> vector<64x128xf32>
    %c0_3 = arith.constant 0 : index
    %c0_4 = arith.constant 0 : index
    %3 = vector.load %arg3[%c0_3, %c0_4] : memref<1x128xf32, #tpu.memory_space<vmem>>, vector<1x128xf32>
    %4 = vector.broadcast %3 : vector<1x128xf32> to vector<64x128xf32>
    %5 = arith.addf %2, %4 : vector<64x128xf32>
    %c0_5 = arith.constant 0 : index
    %c0_6 = arith.constant 0 : index
    %6 = vector.load %arg10[%c0_5, %c0_6] : memref<64x128xf32, #tpu.memory_space<vmem>>, vector<64x128xf32>
    tpu.vector_store %arg10[%c0_5, %c0_6], %5 {strides = array<i32>} : memref<64x128xf32, #tpu.memory_space<vmem>>, vector<64x128xf32>,
    %c0_7 = arith.constant 0 : index
    %c0_8 = arith.constant 0 : index
    %7 = vector.load %arg2[%c0_7, %c0_8] : memref<32x128xbf16, #tpu.memory_space<vmem>>, vector<32x128xbf16>
    %c0_9 = arith.constant 0 : index
    %c0_10 = arith.constant 0 : index
    %8 = vector.load %arg4[%c0_9, %c0_10] : memref<32x128xbf16, #tpu.memory_space<vmem>>, vector<32x128xbf16>
    %c0_11 = arith.constant 0 : index
    %c0_12 = arith.constant 0 : index
    %9 = vector.load %arg5[%c0_11, %c0_12] : memref<32x128xbf16, #tpu.memory_space<vmem>>, vector<32x128xbf16>
    %c0_13 = arith.constant 0 : index
    %c0_14 = arith.constant 0 : index
    %10 = vector.load %arg6[%c0_13, %c0_14] : memref<1x128xf32, #tpu.memory_space<vmem>>, vector<1x128xf32>
    %cst_15 = arith.constant 0.000000e+00 : f32
    %11 = vector.broadcast %cst_15 : f32 to vector<8x32xf32>
    %cst_16 = arith.constant 0.000000e+00 : f32
    %12 = vector.broadcast %cst_16 : f32 to vector<8x10xf32>
    %c0_17 = arith.constant 0 : index
    %c0_18 = arith.constant 0 : index
    %13 = vector.load %arg10[%c0_17, %c0_18] : memref<64x128xf32, #tpu.memory_space<vmem>>, vector<8x128xf32>
    %14 = arith.truncf %11 : vector<8x32xf32> to vector<8x32xbf16>
    %cst_19 = arith.constant dense<0.000000e+00> : vector<8x128xf32>
    %15 = tpu.matmul %14, %7, %cst_19 {dimension_numbers = #tpu.dot_dimension_numbers<[1], [0], [0], [1], [0, 0, 1, 1], [], []>} : vector<8x32xbf16>, vector<32x128xbf16>, vector<8x128xf32> -> vector<8x128xf32>
    %16 = arith.addf %13, %15 : vector<8x128xf32>
    %cst_20 = arith.constant 5.000000e-01 : f32
    %17 = vector.broadcast %cst_20 : f32 to vector<8x128xf32>
    %18 = arith.mulf %17, %16 : vector<8x128xf32>
    %19 = math.tanh %18 : vector<8x128xf32>
    %cst_21 = arith.constant 5.000000e-01 : f32
    %20 = vector.broadcast %cst_21 : f32 to vector<8x128xf32>
    %21 = arith.mulf %20, %19 : vector<8x128xf32>
    %cst_22 = arith.constant 5.000000e-01 : f32
    %22 = vector.broadcast %cst_22 : f32 to vector<8x128xf32>
    %23 = arith.addf %21, %22 : vector<8x128xf32>
    %24 = vector.extract_strided_slice %23 {offsets = [0, 0], sizes = [8, 32], strides = [1, 1]} : vector<8x128xf32> to vector<8x32xf32>
    %25 = vector.extract_strided_slice %23 {offsets = [0, 32], sizes = [8, 32], strides = [1, 1]} : vector<8x128xf32> to vector<8x32xf32>
    %26 = vector.extract_strided_slice %23 {offsets = [0, 96], sizes = [8, 32], strides = [1, 1]} : vector<8x128xf32> to vector<8x32xf32>
    %27 = vector.extract_strided_slice %16 {offsets = [0, 64], sizes = [8, 32], strides = [1, 1]} : vector<8x128xf32> to vector<8x32xf32>
    %28 = math.tanh %27 : vector<8x32xf32>
    %29 = arith.mulf %25, %11 : vector<8x32xf32>
    %30 = arith.mulf %24, %28 : vector<8x32xf32>
    %31 = arith.addf %29, %30 : vector<8x32xf32>
    %32 = math.tanh %31 : vector<8x32xf32>
    %33 = arith.mulf %26, %32 : vector<8x32xf32>
    %34 = arith.truncf %33 : vector<8x32xf32> to vector<8x32xbf16>
    %cst_23 = arith.constant dense<0.000000e+00> : vector<8x128xf32>
    %35 = tpu.matmul %34, %8, %cst_23 {dimension_numbers = #tpu.dot_dimension_numbers<[1], [0], [0], [1], [0, 0, 1, 1], [], []>} : vector<8x32xbf16>, vector<32x128xbf16>, vector<8x128xf32> -> vector<8x128xf32>
    %36 = vector.broadcast %10 : vector<1x128xf32> to vector<8x128xf32>
    %37 = arith.addf %35, %36 : vector<8x128xf32>
    %38 = arith.truncf %11 : vector<8x32xf32> to vector<8x32xbf16>
    %cst_24 = arith.constant dense<0.000000e+00> : vector<8x128xf32>
    %39 = tpu.matmul %38, %9, %cst_24 {dimension_numbers = #tpu.dot_dimension_numbers<[1], [0], [0], [1], [0, 0, 1, 1], [], []>} : vector<8x32xbf16>, vector<32x128xbf16>, vector<8x128xf32> -> vector<8x128xf32>
    %40 = arith.addf %37, %39 : vector<8x128xf32>
    %cst_25 = arith.constant 5.000000e-01 : f32
    %41 = vector.broadcast %cst_25 : f32 to vector<8x128xf32>
    %42 = arith.mulf %41, %40 : vector<8x128xf32>
    %43 = math.tanh %42 : vector<8x128xf32>
    %cst_26 = arith.constant 5.000000e-01 : f32
    %44 = vector.broadcast %cst_26 : f32 to vector<8x128xf32>
    %45 = arith.mulf %44, %43 : vector<8x128xf32>
    %cst_27 = arith.constant 5.000000e-01 : f32
    %46 = vector.broadcast %cst_27 : f32 to vector<8x128xf32>
    %47 = arith.addf %45, %46 : vector<8x128xf32>
    %48 = vector.extract_strided_slice %47 {offsets = [0, 0], sizes = [8, 32], strides = [1, 1]} : vector<8x128xf32> to vector<8x32xf32>
    %49 = vector.extract_strided_slice %47 {offsets = [0, 32], sizes = [8, 32], strides = [1, 1]} : vector<8x128xf32> to vector<8x32xf32>
    %50 = vector.extract_strided_slice %47 {offsets = [0, 96], sizes = [8, 32], strides = [1, 1]} : vector<8x128xf32> to vector<8x32xf32>
    %51 = vector.extract_strided_slice %40 {offsets = [0, 64], sizes = [8, 32], strides = [1, 1]} : vector<8x128xf32> to vector<8x32xf32>
    %52 = math.tanh %51 : vector<8x32xf32>
    %53 = arith.mulf %49, %11 : vector<8x32xf32>
    %54 = arith.mulf %48, %52 : vector<8x32xf32>
    %55 = arith.addf %53, %54 : vector<8x32xf32>
    %56 = math.tanh %55 : vector<8x32xf32>
    %57 = arith.mulf %50, %56 : vector<8x32xf32>
    %58 = arith.truncf %57 : vector<8x32xf32> to vector<8x32xbf16>
    %c0_28 = arith.constant 0 : index
    %c0_29 = arith.constant 0 : index
    %59 = vector.load %arg7[%c0_28, %c0_29] : memref<256x10xbf16, #tpu.memory_space<vmem>>, vector<32x10xbf16>
    %cst_30 = arith.constant dense<0.000000e+00> : vector<8x10xf32>
    %60 = tpu.matmul %58, %59, %cst_30 {dimension_numbers = #tpu.dot_dimension_numbers<[1], [0], [0], [1], [0, 0, 1, 1], [], []>} : vector<8x32xbf16>, vector<32x10xbf16>, vector<8x10xf32> -> vector<8x10xf32>
    %61 = arith.addf %12, %60 : vector<8x10xf32>
    %c8 = arith.constant 8 : index
    %c0_31 = arith.constant 0 : index
    %62 = vector.load %arg10[%c8, %c0_31] : memref<64x128xf32, #tpu.memory_space<vmem>>, vector<8x128xf32>
    %63 = arith.truncf %33 : vector<8x32xf32> to vector<8x32xbf16>
    %cst_32 = arith.constant dense<0.000000e+00> : vector<8x128xf32>
    %64 = tpu.matmul %63, %7, %cst_32 {dimension_numbers = #tpu.dot_dimension_numbers<[1], [0], [0], [1], [0, 0, 1, 1], [], []>} : vector<8x32xbf16>, vector<32x128xbf16>, vector<8x128xf32> -> vector<8x128xf32>
    %65 = arith.addf %62, %64 : vector<8x128xf32>
    %cst_33 = arith.constant 5.000000e-01 : f32
    %66 = vector.broadcast %cst_33 : f32 to vector<8x128xf32>
    %67 = arith.mulf %66, %65 : vector<8x128xf32>
    %68 = math.tanh %67 : vector<8x128xf32>
    %cst_34 = arith.constant 5.000000e-01 : f32
    %69 = vector.broadcast %cst_34 : f32 to vector<8x128xf32>
    %70 = arith.mulf %69, %68 : vector<8x128xf32>
    %cst_35 = arith.constant 5.000000e-01 : f32
    %71 = vector.broadcast %cst_35 : f32 to vector<8x128xf32>
    %72 = arith.addf %70, %71 : vector<8x128xf32>
    %73 = vector.extract_strided_slice %72 {offsets = [0, 0], sizes = [8, 32], strides = [1, 1]} : vector<8x128xf32> to vector<8x32xf32>
    %74 = vector.extract_strided_slice %72 {offsets = [0, 32], sizes = [8, 32], strides = [1, 1]} : vector<8x128xf32> to vector<8x32xf32>
    %75 = vector.extract_strided_slice %72 {offsets = [0, 96], sizes = [8, 32], strides = [1, 1]} : vector<8x128xf32> to vector<8x32xf32>
    %76 = vector.extract_strided_slice %65 {offsets = [0, 64], sizes = [8, 32], strides = [1, 1]} : vector<8x128xf32> to vector<8x32xf32>
    %77 = math.tanh %76 : vector<8x32xf32>
    %78 = arith.mulf %74, %31 : vector<8x32xf32>
    %79 = arith.mulf %73, %77 : vector<8x32xf32>
    %80 = arith.addf %78, %79 : vector<8x32xf32>
    %81 = math.tanh %80 : vector<8x32xf32>
    %82 = arith.mulf %75, %81 : vector<8x32xf32>
    %83 = arith.truncf %82 : vector<8x32xf32> to vector<8x32xbf16>
    %cst_36 = arith.constant dense<0.000000e+00> : vector<8x128xf32>
    %84 = tpu.matmul %83, %8, %cst_36 {dimension_numbers = #tpu.dot_dimension_numbers<[1], [0], [0], [1], [0, 0, 1, 1], [], []>} : vector<8x32xbf16>, vector<32x128xbf16>, vector<8x128xf32> -> vector<8x128xf32>
    %85 = vector.broadcast %10 : vector<1x128xf32> to vector<8x128xf32>
    %86 = arith.addf %84, %85 : vector<8x128xf32>
    %87 = arith.truncf %57 : vector<8x32xf32> to vector<8x32xbf16>
    %cst_37 = arith.constant dense<0.000000e+00> : vector<8x128xf32>
    %88 = tpu.matmul %87, %9, %cst_37 {dimension_numbers = #tpu.dot_dimension_numbers<[1], [0], [0], [1], [0, 0, 1, 1], [], []>} : vector<8x32xbf16>, vector<32x128xbf16>, vector<8x128xf32> -> vector<8x128xf32>
    %89 = arith.addf %86, %88 : vector<8x128xf32>
    %cst_38 = arith.constant 5.000000e-01 : f32
    %90 = vector.broadcast %cst_38 : f32 to vector<8x128xf32>
    %91 = arith.mulf %90, %89 : vector<8x128xf32>
    %92 = math.tanh %91 : vector<8x128xf32>
    %cst_39 = arith.constant 5.000000e-01 : f32
    %93 = vector.broadcast %cst_39 : f32 to vector<8x128xf32>
    %94 = arith.mulf %93, %92 : vector<8x128xf32>
    %cst_40 = arith.constant 5.000000e-01 : f32
    %95 = vector.broadcast %cst_40 : f32 to vector<8x128xf32>
    %96 = arith.addf %94, %95 : vector<8x128xf32>
    %97 = vector.extract_strided_slice %96 {offsets = [0, 0], sizes = [8, 32], strides = [1, 1]} : vector<8x128xf32> to vector<8x32xf32>
    %98 = vector.extract_strided_slice %96 {offsets = [0, 32], sizes = [8, 32], strides = [1, 1]} : vector<8x128xf32> to vector<8x32xf32>
    %99 = vector.extract_strided_slice %96 {offsets = [0, 96], sizes = [8, 32], strides = [1, 1]} : vector<8x128xf32> to vector<8x32xf32>
    %100 = vector.extract_strided_slice %89 {offsets = [0, 64], sizes = [8, 32], strides = [1, 1]} : vector<8x128xf32> to vector<8x32xf32>
    %101 = math.tanh %100 : vector<8x32xf32>
    %102 = arith.mulf %98, %55 : vector<8x32xf32>
    %103 = arith.mulf %97, %101 : vector<8x32xf32>
    %104 = arith.addf %102, %103 : vector<8x32xf32>
    %105 = math.tanh %104 : vector<8x32xf32>
    %106 = arith.mulf %99, %105 : vector<8x32xf32>
    %107 = arith.truncf %106 : vector<8x32xf32> to vector<8x32xbf16>
    %c32 = arith.constant 32 : index
    %c0_41 = arith.constant 0 : index
    %108 = vector.load %arg7[%c32, %c0_41] : memref<256x10xbf16, #tpu.memory_space<vmem>>, vector<32x10xbf16>
    %cst_42 = arith.constant dense<0.000000e+00> : vector<8x10xf32>
    %109 = tpu.matmul %107, %108, %cst_42 {dimension_numbers = #tpu.dot_dimension_numbers<[1], [0], [0], [1], [0, 0, 1, 1], [], []>} : vector<8x32xbf16>, vector<32x10xbf16>, vector<8x10xf32> -> vector<8x10xf32>
    %110 = arith.addf %61, %109 : vector<8x10xf32>
    %c16 = arith.constant 16 : index
    %c0_43 = arith.constant 0 : index
    %111 = vector.load %arg10[%c16, %c0_43] : memref<64x128xf32, #tpu.memory_space<vmem>>, vector<8x128xf32>
    %112 = arith.truncf %82 : vector<8x32xf32> to vector<8x32xbf16>
    %cst_44 = arith.constant dense<0.000000e+00> : vector<8x128xf32>
    %113 = tpu.matmul %112, %7, %cst_44 {dimension_numbers = #tpu.dot_dimension_numbers<[1], [0], [0], [1], [0, 0, 1, 1], [], []>} : vector<8x32xbf16>, vector<32x128xbf16>, vector<8x128xf32> -> vector<8x128xf32>
    %114 = arith.addf %111, %113 : vector<8x128xf32>
    %cst_45 = arith.constant 5.000000e-01 : f32
    %115 = vector.broadcast %cst_45 : f32 to vector<8x128xf32>
    %116 = arith.mulf %115, %114 : vector<8x128xf32>
    %117 = math.tanh %116 : vector<8x128xf32>
    %cst_46 = arith.constant 5.000000e-01 : f32
    %118 = vector.broadcast %cst_46 : f32 to vector<8x128xf32>
    %119 = arith.mulf %118, %117 : vector<8x128xf32>
    %cst_47 = arith.constant 5.000000e-01 : f32
    %120 = vector.broadcast %cst_47 : f32 to vector<8x128xf32>
    %121 = arith.addf %119, %120 : vector<8x128xf32>
    %122 = vector.extract_strided_slice %121 {offsets = [0, 0], sizes = [8, 32], strides = [1, 1]} : vector<8x128xf32> to vector<8x32xf32>
    %123 = vector.extract_strided_slice %121 {offsets = [0, 32], sizes = [8, 32], strides = [1, 1]} : vector<8x128xf32> to vector<8x32xf32>
    %124 = vector.extract_strided_slice %121 {offsets = [0, 96], sizes = [8, 32], strides = [1, 1]} : vector<8x128xf32> to vector<8x32xf32>
    %125 = vector.extract_strided_slice %114 {offsets = [0, 64], sizes = [8, 32], strides = [1, 1]} : vector<8x128xf32> to vector<8x32xf32>
    %126 = math.tanh %125 : vector<8x32xf32>
    %127 = arith.mulf %123, %80 : vector<8x32xf32>
    %128 = arith.mulf %122, %126 : vector<8x32xf32>
    %129 = arith.addf %127, %128 : vector<8x32xf32>
    %130 = math.tanh %129 : vector<8x32xf32>
    %131 = arith.mulf %124, %130 : vector<8x32xf32>
    %132 = arith.truncf %131 : vector<8x32xf32> to vector<8x32xbf16>
    %cst_48 = arith.constant dense<0.000000e+00> : vector<8x128xf32>
    %133 = tpu.matmul %132, %8, %cst_48 {dimension_numbers = #tpu.dot_dimension_numbers<[1], [0], [0], [1], [0, 0, 1, 1], [], []>} : vector<8x32xbf16>, vector<32x128xbf16>, vector<8x128xf32> -> vector<8x128xf32>
    %134 = vector.broadcast %10 : vector<1x128xf32> to vector<8x128xf32>
    %135 = arith.addf %133, %134 : vector<8x128xf32>
    %136 = arith.truncf %106 : vector<8x32xf32> to vector<8x32xbf16>
    %cst_49 = arith.constant dense<0.000000e+00> : vector<8x128xf32>
    %137 = tpu.matmul %136, %9, %cst_49 {dimension_numbers = #tpu.dot_dimension_numbers<[1], [0], [0], [1], [0, 0, 1, 1], [], []>} : vector<8x32xbf16>, vector<32x128xbf16>, vector<8x128xf32> -> vector<8x128xf32>
    %138 = arith.addf %135, %137 : vector<8x128xf32>
    %cst_50 = arith.constant 5.000000e-01 : f32
    %139 = vector.broadcast %cst_50 : f32 to vector<8x128xf32>
    %140 = arith.mulf %139, %138 : vector<8x128xf32>
    %141 = math.tanh %140 : vector<8x128xf32>
    %cst_51 = arith.constant 5.000000e-01 : f32
    %142 = vector.broadcast %cst_51 : f32 to vector<8x128xf32>
    %143 = arith.mulf %142, %141 : vector<8x128xf32>
    %cst_52 = arith.constant 5.000000e-01 : f32
    %144 = vector.broadcast %cst_52 : f32 to vector<8x128xf32>
    %145 = arith.addf %143, %144 : vector<8x128xf32>
    %146 = vector.extract_strided_slice %145 {offsets = [0, 0], sizes = [8, 32], strides = [1, 1]} : vector<8x128xf32> to vector<8x32xf32>
    %147 = vector.extract_strided_slice %145 {offsets = [0, 32], sizes = [8, 32], strides = [1, 1]} : vector<8x128xf32> to vector<8x32xf32>
    %148 = vector.extract_strided_slice %145 {offsets = [0, 96], sizes = [8, 32], strides = [1, 1]} : vector<8x128xf32> to vector<8x32xf32>
    %149 = vector.extract_strided_slice %138 {offsets = [0, 64], sizes = [8, 32], strides = [1, 1]} : vector<8x128xf32> to vector<8x32xf32>
    %150 = math.tanh %149 : vector<8x32xf32>
    %151 = arith.mulf %147, %104 : vector<8x32xf32>
    %152 = arith.mulf %146, %150 : vector<8x32xf32>
    %153 = arith.addf %151, %152 : vector<8x32xf32>
    %154 = math.tanh %153 : vector<8x32xf32>
    %155 = arith.mulf %148, %154 : vector<8x32xf32>
    %156 = arith.truncf %155 : vector<8x32xf32> to vector<8x32xbf16>
    %c64 = arith.constant 64 : index
    %c0_53 = arith.constant 0 : index
    %157 = vector.load %arg7[%c64, %c0_53] : memref<256x10xbf16, #tpu.memory_space<vmem>>, vector<32x10xbf16>
    %cst_54 = arith.constant dense<0.000000e+00> : vector<8x10xf32>
    %158 = tpu.matmul %156, %157, %cst_54 {dimension_numbers = #tpu.dot_dimension_numbers<[1], [0], [0], [1], [0, 0, 1, 1], [], []>} : vector<8x32xbf16>, vector<32x10xbf16>, vector<8x10xf32> -> vector<8x10xf32>
    %159 = arith.addf %110, %158 : vector<8x10xf32>
    %c24 = arith.constant 24 : index
    %c0_55 = arith.constant 0 : index
    %160 = vector.load %arg10[%c24, %c0_55] : memref<64x128xf32, #tpu.memory_space<vmem>>, vector<8x128xf32>
    %161 = arith.truncf %131 : vector<8x32xf32> to vector<8x32xbf16>
    %cst_56 = arith.constant dense<0.000000e+00> : vector<8x128xf32>
    %162 = tpu.matmul %161, %7, %cst_56 {dimension_numbers = #tpu.dot_dimension_numbers<[1], [0], [0], [1], [0, 0, 1, 1], [], []>} : vector<8x32xbf16>, vector<32x128xbf16>, vector<8x128xf32> -> vector<8x128xf32>
    %163 = arith.addf %160, %162 : vector<8x128xf32>
    %cst_57 = arith.constant 5.000000e-01 : f32
    %164 = vector.broadcast %cst_57 : f32 to vector<8x128xf32>
    %165 = arith.mulf %164, %163 : vector<8x128xf32>
    %166 = math.tanh %165 : vector<8x128xf32>
    %cst_58 = arith.constant 5.000000e-01 : f32
    %167 = vector.broadcast %cst_58 : f32 to vector<8x128xf32>
    %168 = arith.mulf %167, %166 : vector<8x128xf32>
    %cst_59 = arith.constant 5.000000e-01 : f32
    %169 = vector.broadcast %cst_59 : f32 to vector<8x128xf32>
    %170 = arith.addf %168, %169 : vector<8x128xf32>
    %171 = vector.extract_strided_slice %170 {offsets = [0, 0], sizes = [8, 32], strides = [1, 1]} : vector<8x128xf32> to vector<8x32xf32>
    %172 = vector.extract_strided_slice %170 {offsets = [0, 32], sizes = [8, 32], strides = [1, 1]} : vector<8x128xf32> to vector<8x32xf32>
    %173 = vector.extract_strided_slice %170 {offsets = [0, 96], sizes = [8, 32], strides = [1, 1]} : vector<8x128xf32> to vector<8x32xf32>
    %174 = vector.extract_strided_slice %163 {offsets = [0, 64], sizes = [8, 32], strides = [1, 1]} : vector<8x128xf32> to vector<8x32xf32>
    %175 = math.tanh %174 : vector<8x32xf32>
    %176 = arith.mulf %172, %129 : vector<8x32xf32>
    %177 = arith.mulf %171, %175 : vector<8x32xf32>
    %178 = arith.addf %176, %177 : vector<8x32xf32>
    %179 = math.tanh %178 : vector<8x32xf32>
    %180 = arith.mulf %173, %179 : vector<8x32xf32>
    %181 = arith.truncf %180 : vector<8x32xf32> to vector<8x32xbf16>
    %cst_60 = arith.constant dense<0.000000e+00> : vector<8x128xf32>
    %182 = tpu.matmul %181, %8, %cst_60 {dimension_numbers = #tpu.dot_dimension_numbers<[1], [0], [0], [1], [0, 0, 1, 1], [], []>} : vector<8x32xbf16>, vector<32x128xbf16>, vector<8x128xf32> -> vector<8x128xf32>
    %183 = vector.broadcast %10 : vector<1x128xf32> to vector<8x128xf32>
    %184 = arith.addf %182, %183 : vector<8x128xf32>
    %185 = arith.truncf %155 : vector<8x32xf32> to vector<8x32xbf16>
    %cst_61 = arith.constant dense<0.000000e+00> : vector<8x128xf32>
    %186 = tpu.matmul %185, %9, %cst_61 {dimension_numbers = #tpu.dot_dimension_numbers<[1], [0], [0], [1], [0, 0, 1, 1], [], []>} : vector<8x32xbf16>, vector<32x128xbf16>, vector<8x128xf32> -> vector<8x128xf32>
    %187 = arith.addf %184, %186 : vector<8x128xf32>
    %cst_62 = arith.constant 5.000000e-01 : f32
    %188 = vector.broadcast %cst_62 : f32 to vector<8x128xf32>
    %189 = arith.mulf %188, %187 : vector<8x128xf32>
    %190 = math.tanh %189 : vector<8x128xf32>
    %cst_63 = arith.constant 5.000000e-01 : f32
    %191 = vector.broadcast %cst_63 : f32 to vector<8x128xf32>
    %192 = arith.mulf %191, %190 : vector<8x128xf32>
    %cst_64 = arith.constant 5.000000e-01 : f32
    %193 = vector.broadcast %cst_64 : f32 to vector<8x128xf32>
    %194 = arith.addf %192, %193 : vector<8x128xf32>
    %195 = vector.extract_strided_slice %194 {offsets = [0, 0], sizes = [8, 32], strides = [1, 1]} : vector<8x128xf32> to vector<8x32xf32>
    %196 = vector.extract_strided_slice %194 {offsets = [0, 32], sizes = [8, 32], strides = [1, 1]} : vector<8x128xf32> to vector<8x32xf32>
    %197 = vector.extract_strided_slice %194 {offsets = [0, 96], sizes = [8, 32], strides = [1, 1]} : vector<8x128xf32> to vector<8x32xf32>
    %198 = vector.extract_strided_slice %187 {offsets = [0, 64], sizes = [8, 32], strides = [1, 1]} : vector<8x128xf32> to vector<8x32xf32>
    %199 = math.tanh %198 : vector<8x32xf32>
    %200 = arith.mulf %196, %153 : vector<8x32xf32>
    %201 = arith.mulf %195, %199 : vector<8x32xf32>
    %202 = arith.addf %200, %201 : vector<8x32xf32>
    %203 = math.tanh %202 : vector<8x32xf32>
    %204 = arith.mulf %197, %203 : vector<8x32xf32>
    %205 = arith.truncf %204 : vector<8x32xf32> to vector<8x32xbf16>
    %c96 = arith.constant 96 : index
    %c0_65 = arith.constant 0 : index
    %206 = vector.load %arg7[%c96, %c0_65] : memref<256x10xbf16, #tpu.memory_space<vmem>>, vector<32x10xbf16>
    %cst_66 = arith.constant dense<0.000000e+00> : vector<8x10xf32>
    %207 = tpu.matmul %205, %206, %cst_66 {dimension_numbers = #tpu.dot_dimension_numbers<[1], [0], [0], [1], [0, 0, 1, 1], [], []>} : vector<8x32xbf16>, vector<32x10xbf16>, vector<8x10xf32> -> vector<8x10xf32>
    %208 = arith.addf %159, %207 : vector<8x10xf32>
    %c32_67 = arith.constant 32 : index
    %c0_68 = arith.constant 0 : index
    %209 = vector.load %arg10[%c32_67, %c0_68] : memref<64x128xf32, #tpu.memory_space<vmem>>, vector<8x128xf32>
    %210 = arith.truncf %180 : vector<8x32xf32> to vector<8x32xbf16>
    %cst_69 = arith.constant dense<0.000000e+00> : vector<8x128xf32>
    %211 = tpu.matmul %210, %7, %cst_69 {dimension_numbers = #tpu.dot_dimension_numbers<[1], [0], [0], [1], [0, 0, 1, 1], [], []>} : vector<8x32xbf16>, vector<32x128xbf16>, vector<8x128xf32> -> vector<8x128xf32>
    %212 = arith.addf %209, %211 : vector<8x128xf32>
    %cst_70 = arith.constant 5.000000e-01 : f32
    %213 = vector.broadcast %cst_70 : f32 to vector<8x128xf32>
    %214 = arith.mulf %213, %212 : vector<8x128xf32>
    %215 = math.tanh %214 : vector<8x128xf32>
    %cst_71 = arith.constant 5.000000e-01 : f32
    %216 = vector.broadcast %cst_71 : f32 to vector<8x128xf32>
    %217 = arith.mulf %216, %215 : vector<8x128xf32>
    %cst_72 = arith.constant 5.000000e-01 : f32
    %218 = vector.broadcast %cst_72 : f32 to vector<8x128xf32>
    %219 = arith.addf %217, %218 : vector<8x128xf32>
    %220 = vector.extract_strided_slice %219 {offsets = [0, 0], sizes = [8, 32], strides = [1, 1]} : vector<8x128xf32> to vector<8x32xf32>
    %221 = vector.extract_strided_slice %219 {offsets = [0, 32], sizes = [8, 32], strides = [1, 1]} : vector<8x128xf32> to vector<8x32xf32>
    %222 = vector.extract_strided_slice %219 {offsets = [0, 96], sizes = [8, 32], strides = [1, 1]} : vector<8x128xf32> to vector<8x32xf32>
    %223 = vector.extract_strided_slice %212 {offsets = [0, 64], sizes = [8, 32], strides = [1, 1]} : vector<8x128xf32> to vector<8x32xf32>
    %224 = math.tanh %223 : vector<8x32xf32>
    %225 = arith.mulf %221, %178 : vector<8x32xf32>
    %226 = arith.mulf %220, %224 : vector<8x32xf32>
    %227 = arith.addf %225, %226 : vector<8x32xf32>
    %228 = math.tanh %227 : vector<8x32xf32>
    %229 = arith.mulf %222, %228 : vector<8x32xf32>
    %230 = arith.truncf %229 : vector<8x32xf32> to vector<8x32xbf16>
    %cst_73 = arith.constant dense<0.000000e+00> : vector<8x128xf32>
    %231 = tpu.matmul %230, %8, %cst_73 {dimension_numbers = #tpu.dot_dimension_numbers<[1], [0], [0], [1], [0, 0, 1, 1], [], []>} : vector<8x32xbf16>, vector<32x128xbf16>, vector<8x128xf32> -> vector<8x128xf32>
    %232 = vector.broadcast %10 : vector<1x128xf32> to vector<8x128xf32>
    %233 = arith.addf %231, %232 : vector<8x128xf32>
    %234 = arith.truncf %204 : vector<8x32xf32> to vector<8x32xbf16>
    %cst_74 = arith.constant dense<0.000000e+00> : vector<8x128xf32>
    %235 = tpu.matmul %234, %9, %cst_74 {dimension_numbers = #tpu.dot_dimension_numbers<[1], [0], [0], [1], [0, 0, 1, 1], [], []>} : vector<8x32xbf16>, vector<32x128xbf16>, vector<8x128xf32> -> vector<8x128xf32>
    %236 = arith.addf %233, %235 : vector<8x128xf32>
    %cst_75 = arith.constant 5.000000e-01 : f32
    %237 = vector.broadcast %cst_75 : f32 to vector<8x128xf32>
    %238 = arith.mulf %237, %236 : vector<8x128xf32>
    %239 = math.tanh %238 : vector<8x128xf32>
    %cst_76 = arith.constant 5.000000e-01 : f32
    %240 = vector.broadcast %cst_76 : f32 to vector<8x128xf32>
    %241 = arith.mulf %240, %239 : vector<8x128xf32>
    %cst_77 = arith.constant 5.000000e-01 : f32
    %242 = vector.broadcast %cst_77 : f32 to vector<8x128xf32>
    %243 = arith.addf %241, %242 : vector<8x128xf32>
    %244 = vector.extract_strided_slice %243 {offsets = [0, 0], sizes = [8, 32], strides = [1, 1]} : vector<8x128xf32> to vector<8x32xf32>
    %245 = vector.extract_strided_slice %243 {offsets = [0, 32], sizes = [8, 32], strides = [1, 1]} : vector<8x128xf32> to vector<8x32xf32>
    %246 = vector.extract_strided_slice %243 {offsets = [0, 96], sizes = [8, 32], strides = [1, 1]} : vector<8x128xf32> to vector<8x32xf32>
    %247 = vector.extract_strided_slice %236 {offsets = [0, 64], sizes = [8, 32], strides = [1, 1]} : vector<8x128xf32> to vector<8x32xf32>
    %248 = math.tanh %247 : vector<8x32xf32>
    %249 = arith.mulf %245, %202 : vector<8x32xf32>
    %250 = arith.mulf %244, %248 : vector<8x32xf32>
    %251 = arith.addf %249, %250 : vector<8x32xf32>
    %252 = math.tanh %251 : vector<8x32xf32>
    %253 = arith.mulf %246, %252 : vector<8x32xf32>
    %254 = arith.truncf %253 : vector<8x32xf32> to vector<8x32xbf16>
    %c128 = arith.constant 128 : index
    %c0_78 = arith.constant 0 : index
    %255 = vector.load %arg7[%c128, %c0_78] : memref<256x10xbf16, #tpu.memory_space<vmem>>, vector<32x10xbf16>
    %cst_79 = arith.constant dense<0.000000e+00> : vector<8x10xf32>
    %256 = tpu.matmul %254, %255, %cst_79 {dimension_numbers = #tpu.dot_dimension_numbers<[1], [0], [0], [1], [0, 0, 1, 1], [], []>} : vector<8x32xbf16>, vector<32x10xbf16>, vector<8x10xf32> -> vector<8x10xf32>
    %257 = arith.addf %208, %256 : vector<8x10xf32>
    %c40 = arith.constant 40 : index
    %c0_80 = arith.constant 0 : index
    %258 = vector.load %arg10[%c40, %c0_80] : memref<64x128xf32, #tpu.memory_space<vmem>>, vector<8x128xf32>
    %259 = arith.truncf %229 : vector<8x32xf32> to vector<8x32xbf16>
    %cst_81 = arith.constant dense<0.000000e+00> : vector<8x128xf32>
    %260 = tpu.matmul %259, %7, %cst_81 {dimension_numbers = #tpu.dot_dimension_numbers<[1], [0], [0], [1], [0, 0, 1, 1], [], []>} : vector<8x32xbf16>, vector<32x128xbf16>, vector<8x128xf32> -> vector<8x128xf32>
    %261 = arith.addf %258, %260 : vector<8x128xf32>
    %cst_82 = arith.constant 5.000000e-01 : f32
    %262 = vector.broadcast %cst_82 : f32 to vector<8x128xf32>
    %263 = arith.mulf %262, %261 : vector<8x128xf32>
    %264 = math.tanh %263 : vector<8x128xf32>
    %cst_83 = arith.constant 5.000000e-01 : f32
    %265 = vector.broadcast %cst_83 : f32 to vector<8x128xf32>
    %266 = arith.mulf %265, %264 : vector<8x128xf32>
    %cst_84 = arith.constant 5.000000e-01 : f32
    %267 = vector.broadcast %cst_84 : f32 to vector<8x128xf32>
    %268 = arith.addf %266, %267 : vector<8x128xf32>
    %269 = vector.extract_strided_slice %268 {offsets = [0, 0], sizes = [8, 32], strides = [1, 1]} : vector<8x128xf32> to vector<8x32xf32>
    %270 = vector.extract_strided_slice %268 {offsets = [0, 32], sizes = [8, 32], strides = [1, 1]} : vector<8x128xf32> to vector<8x32xf32>
    %271 = vector.extract_strided_slice %268 {offsets = [0, 96], sizes = [8, 32], strides = [1, 1]} : vector<8x128xf32> to vector<8x32xf32>
    %272 = vector.extract_strided_slice %261 {offsets = [0, 64], sizes = [8, 32], strides = [1, 1]} : vector<8x128xf32> to vector<8x32xf32>
    %273 = math.tanh %272 : vector<8x32xf32>
    %274 = arith.mulf %270, %227 : vector<8x32xf32>
    %275 = arith.mulf %269, %273 : vector<8x32xf32>
    %276 = arith.addf %274, %275 : vector<8x32xf32>
    %277 = math.tanh %276 : vector<8x32xf32>
    %278 = arith.mulf %271, %277 : vector<8x32xf32>
    %279 = arith.truncf %278 : vector<8x32xf32> to vector<8x32xbf16>
    %cst_85 = arith.constant dense<0.000000e+00> : vector<8x128xf32>
    %280 = tpu.matmul %279, %8, %cst_85 {dimension_numbers = #tpu.dot_dimension_numbers<[1], [0], [0], [1], [0, 0, 1, 1], [], []>} : vector<8x32xbf16>, vector<32x128xbf16>, vector<8x128xf32> -> vector<8x128xf32>
    %281 = vector.broadcast %10 : vector<1x128xf32> to vector<8x128xf32>
    %282 = arith.addf %280, %281 : vector<8x128xf32>
    %283 = arith.truncf %253 : vector<8x32xf32> to vector<8x32xbf16>
    %cst_86 = arith.constant dense<0.000000e+00> : vector<8x128xf32>
    %284 = tpu.matmul %283, %9, %cst_86 {dimension_numbers = #tpu.dot_dimension_numbers<[1], [0], [0], [1], [0, 0, 1, 1], [], []>} : vector<8x32xbf16>, vector<32x128xbf16>, vector<8x128xf32> -> vector<8x128xf32>
    %285 = arith.addf %282, %284 : vector<8x128xf32>
    %cst_87 = arith.constant 5.000000e-01 : f32
    %286 = vector.broadcast %cst_87 : f32 to vector<8x128xf32>
    %287 = arith.mulf %286, %285 : vector<8x128xf32>
    %288 = math.tanh %287 : vector<8x128xf32>
    %cst_88 = arith.constant 5.000000e-01 : f32
    %289 = vector.broadcast %cst_88 : f32 to vector<8x128xf32>
    %290 = arith.mulf %289, %288 : vector<8x128xf32>
    %cst_89 = arith.constant 5.000000e-01 : f32
    %291 = vector.broadcast %cst_89 : f32 to vector<8x128xf32>
    %292 = arith.addf %290, %291 : vector<8x128xf32>
    %293 = vector.extract_strided_slice %292 {offsets = [0, 0], sizes = [8, 32], strides = [1, 1]} : vector<8x128xf32> to vector<8x32xf32>
    %294 = vector.extract_strided_slice %292 {offsets = [0, 32], sizes = [8, 32], strides = [1, 1]} : vector<8x128xf32> to vector<8x32xf32>
    %295 = vector.extract_strided_slice %292 {offsets = [0, 96], sizes = [8, 32], strides = [1, 1]} : vector<8x128xf32> to vector<8x32xf32>
    %296 = vector.extract_strided_slice %285 {offsets = [0, 64], sizes = [8, 32], strides = [1, 1]} : vector<8x128xf32> to vector<8x32xf32>
    %297 = math.tanh %296 : vector<8x32xf32>
    %298 = arith.mulf %294, %251 : vector<8x32xf32>
    %299 = arith.mulf %293, %297 : vector<8x32xf32>
    %300 = arith.addf %298, %299 : vector<8x32xf32>
    %301 = math.tanh %300 : vector<8x32xf32>
    %302 = arith.mulf %295, %301 : vector<8x32xf32>
    %303 = arith.truncf %302 : vector<8x32xf32> to vector<8x32xbf16>
    %c160 = arith.constant 160 : index
    %c0_90 = arith.constant 0 : index
    %304 = vector.load %arg7[%c160, %c0_90] : memref<256x10xbf16, #tpu.memory_space<vmem>>, vector<32x10xbf16>
    %cst_91 = arith.constant dense<0.000000e+00> : vector<8x10xf32>
    %305 = tpu.matmul %303, %304, %cst_91 {dimension_numbers = #tpu.dot_dimension_numbers<[1], [0], [0], [1], [0, 0, 1, 1], [], []>} : vector<8x32xbf16>, vector<32x10xbf16>, vector<8x10xf32> -> vector<8x10xf32>
    %306 = arith.addf %257, %305 : vector<8x10xf32>
    %c48 = arith.constant 48 : index
    %c0_92 = arith.constant 0 : index
    %307 = vector.load %arg10[%c48, %c0_92] : memref<64x128xf32, #tpu.memory_space<vmem>>, vector<8x128xf32>
    %308 = arith.truncf %278 : vector<8x32xf32> to vector<8x32xbf16>
    %cst_93 = arith.constant dense<0.000000e+00> : vector<8x128xf32>
    %309 = tpu.matmul %308, %7, %cst_93 {dimension_numbers = #tpu.dot_dimension_numbers<[1], [0], [0], [1], [0, 0, 1, 1], [], []>} : vector<8x32xbf16>, vector<32x128xbf16>, vector<8x128xf32> -> vector<8x128xf32>
    %310 = arith.addf %307, %309 : vector<8x128xf32>
    %cst_94 = arith.constant 5.000000e-01 : f32
    %311 = vector.broadcast %cst_94 : f32 to vector<8x128xf32>
    %312 = arith.mulf %311, %310 : vector<8x128xf32>
    %313 = math.tanh %312 : vector<8x128xf32>
    %cst_95 = arith.constant 5.000000e-01 : f32
    %314 = vector.broadcast %cst_95 : f32 to vector<8x128xf32>
    %315 = arith.mulf %314, %313 : vector<8x128xf32>
    %cst_96 = arith.constant 5.000000e-01 : f32
    %316 = vector.broadcast %cst_96 : f32 to vector<8x128xf32>
    %317 = arith.addf %315, %316 : vector<8x128xf32>
    %318 = vector.extract_strided_slice %317 {offsets = [0, 0], sizes = [8, 32], strides = [1, 1]} : vector<8x128xf32> to vector<8x32xf32>
    %319 = vector.extract_strided_slice %317 {offsets = [0, 32], sizes = [8, 32], strides = [1, 1]} : vector<8x128xf32> to vector<8x32xf32>
    %320 = vector.extract_strided_slice %317 {offsets = [0, 96], sizes = [8, 32], strides = [1, 1]} : vector<8x128xf32> to vector<8x32xf32>
    %321 = vector.extract_strided_slice %310 {offsets = [0, 64], sizes = [8, 32], strides = [1, 1]} : vector<8x128xf32> to vector<8x32xf32>
    %322 = math.tanh %321 : vector<8x32xf32>
    %323 = arith.mulf %319, %276 : vector<8x32xf32>
    %324 = arith.mulf %318, %322 : vector<8x32xf32>
    %325 = arith.addf %323, %324 : vector<8x32xf32>
    %326 = math.tanh %325 : vector<8x32xf32>
    %327 = arith.mulf %320, %326 : vector<8x32xf32>
    %328 = arith.truncf %327 : vector<8x32xf32> to vector<8x32xbf16>
    %cst_97 = arith.constant dense<0.000000e+00> : vector<8x128xf32>
    %329 = tpu.matmul %328, %8, %cst_97 {dimension_numbers = #tpu.dot_dimension_numbers<[1], [0], [0], [1], [0, 0, 1, 1], [], []>} : vector<8x32xbf16>, vector<32x128xbf16>, vector<8x128xf32> -> vector<8x128xf32>
    %330 = vector.broadcast %10 : vector<1x128xf32> to vector<8x128xf32>
    %331 = arith.addf %329, %330 : vector<8x128xf32>
    %332 = arith.truncf %302 : vector<8x32xf32> to vector<8x32xbf16>
    %cst_98 = arith.constant dense<0.000000e+00> : vector<8x128xf32>
    %333 = tpu.matmul %332, %9, %cst_98 {dimension_numbers = #tpu.dot_dimension_numbers<[1], [0], [0], [1], [0, 0, 1, 1], [], []>} : vector<8x32xbf16>, vector<32x128xbf16>, vector<8x128xf32> -> vector<8x128xf32>
    %334 = arith.addf %331, %333 : vector<8x128xf32>
    %cst_99 = arith.constant 5.000000e-01 : f32
    %335 = vector.broadcast %cst_99 : f32 to vector<8x128xf32>
    %336 = arith.mulf %335, %334 : vector<8x128xf32>
    %337 = math.tanh %336 : vector<8x128xf32>
    %cst_100 = arith.constant 5.000000e-01 : f32
    %338 = vector.broadcast %cst_100 : f32 to vector<8x128xf32>
    %339 = arith.mulf %338, %337 : vector<8x128xf32>
    %cst_101 = arith.constant 5.000000e-01 : f32
    %340 = vector.broadcast %cst_101 : f32 to vector<8x128xf32>
    %341 = arith.addf %339, %340 : vector<8x128xf32>
    %342 = vector.extract_strided_slice %341 {offsets = [0, 0], sizes = [8, 32], strides = [1, 1]} : vector<8x128xf32> to vector<8x32xf32>
    %343 = vector.extract_strided_slice %341 {offsets = [0, 32], sizes = [8, 32], strides = [1, 1]} : vector<8x128xf32> to vector<8x32xf32>
    %344 = vector.extract_strided_slice %341 {offsets = [0, 96], sizes = [8, 32], strides = [1, 1]} : vector<8x128xf32> to vector<8x32xf32>
    %345 = vector.extract_strided_slice %334 {offsets = [0, 64], sizes = [8, 32], strides = [1, 1]} : vector<8x128xf32> to vector<8x32xf32>
    %346 = math.tanh %345 : vector<8x32xf32>
    %347 = arith.mulf %343, %300 : vector<8x32xf32>
    %348 = arith.mulf %342, %346 : vector<8x32xf32>
    %349 = arith.addf %347, %348 : vector<8x32xf32>
    %350 = math.tanh %349 : vector<8x32xf32>
    %351 = arith.mulf %344, %350 : vector<8x32xf32>
    %352 = arith.truncf %351 : vector<8x32xf32> to vector<8x32xbf16>
    %c192 = arith.constant 192 : index
    %c0_102 = arith.constant 0 : index
    %353 = vector.load %arg7[%c192, %c0_102] : memref<256x10xbf16, #tpu.memory_space<vmem>>, vector<32x10xbf16>
    %cst_103 = arith.constant dense<0.000000e+00> : vector<8x10xf32>
    %354 = tpu.matmul %352, %353, %cst_103 {dimension_numbers = #tpu.dot_dimension_numbers<[1], [0], [0], [1], [0, 0, 1, 1], [], []>} : vector<8x32xbf16>, vector<32x10xbf16>, vector<8x10xf32> -> vector<8x10xf32>
    %355 = arith.addf %306, %354 : vector<8x10xf32>
    %c56 = arith.constant 56 : index
    %c0_104 = arith.constant 0 : index
    %356 = vector.load %arg10[%c56, %c0_104] : memref<64x128xf32, #tpu.memory_space<vmem>>, vector<8x128xf32>
    %357 = arith.truncf %327 : vector<8x32xf32> to vector<8x32xbf16>
    %cst_105 = arith.constant dense<0.000000e+00> : vector<8x128xf32>
    %358 = tpu.matmul %357, %7, %cst_105 {dimension_numbers = #tpu.dot_dimension_numbers<[1], [0], [0], [1], [0, 0, 1, 1], [], []>} : vector<8x32xbf16>, vector<32x128xbf16>, vector<8x128xf32> -> vector<8x128xf32>
    %359 = arith.addf %356, %358 : vector<8x128xf32>
    %cst_106 = arith.constant 5.000000e-01 : f32
    %360 = vector.broadcast %cst_106 : f32 to vector<8x128xf32>
    %361 = arith.mulf %360, %359 : vector<8x128xf32>
    %362 = math.tanh %361 : vector<8x128xf32>
    %cst_107 = arith.constant 5.000000e-01 : f32
    %363 = vector.broadcast %cst_107 : f32 to vector<8x128xf32>
    %364 = arith.mulf %363, %362 : vector<8x128xf32>
    %cst_108 = arith.constant 5.000000e-01 : f32
    %365 = vector.broadcast %cst_108 : f32 to vector<8x128xf32>
    %366 = arith.addf %364, %365 : vector<8x128xf32>
    %367 = vector.extract_strided_slice %366 {offsets = [0, 0], sizes = [8, 32], strides = [1, 1]} : vector<8x128xf32> to vector<8x32xf32>
    %368 = vector.extract_strided_slice %366 {offsets = [0, 32], sizes = [8, 32], strides = [1, 1]} : vector<8x128xf32> to vector<8x32xf32>
    %369 = vector.extract_strided_slice %366 {offsets = [0, 96], sizes = [8, 32], strides = [1, 1]} : vector<8x128xf32> to vector<8x32xf32>
    %370 = vector.extract_strided_slice %359 {offsets = [0, 64], sizes = [8, 32], strides = [1, 1]} : vector<8x128xf32> to vector<8x32xf32>
    %371 = math.tanh %370 : vector<8x32xf32>
    %372 = arith.mulf %368, %325 : vector<8x32xf32>
    %373 = arith.mulf %367, %371 : vector<8x32xf32>
    %374 = arith.addf %372, %373 : vector<8x32xf32>
    %375 = math.tanh %374 : vector<8x32xf32>
    %376 = arith.mulf %369, %375 : vector<8x32xf32>
    %377 = arith.truncf %376 : vector<8x32xf32> to vector<8x32xbf16>
    %cst_109 = arith.constant dense<0.000000e+00> : vector<8x128xf32>
    %378 = tpu.matmul %377, %8, %cst_109 {dimension_numbers = #tpu.dot_dimension_numbers<[1], [0], [0], [1], [0, 0, 1, 1], [], []>} : vector<8x32xbf16>, vector<32x128xbf16>, vector<8x128xf32> -> vector<8x128xf32>
    %379 = vector.broadcast %10 : vector<1x128xf32> to vector<8x128xf32>
    %380 = arith.addf %378, %379 : vector<8x128xf32>
    %381 = arith.truncf %351 : vector<8x32xf32> to vector<8x32xbf16>
    %cst_110 = arith.constant dense<0.000000e+00> : vector<8x128xf32>
    %382 = tpu.matmul %381, %9, %cst_110 {dimension_numbers = #tpu.dot_dimension_numbers<[1], [0], [0], [1], [0, 0, 1, 1], [], []>} : vector<8x32xbf16>, vector<32x128xbf16>, vector<8x128xf32> -> vector<8x128xf32>
    %383 = arith.addf %380, %382 : vector<8x128xf32>
    %cst_111 = arith.constant 5.000000e-01 : f32
    %384 = vector.broadcast %cst_111 : f32 to vector<8x128xf32>
    %385 = arith.mulf %384, %383 : vector<8x128xf32>
    %386 = math.tanh %385 : vector<8x128xf32>
    %cst_112 = arith.constant 5.000000e-01 : f32
    %387 = vector.broadcast %cst_112 : f32 to vector<8x128xf32>
    %388 = arith.mulf %387, %386 : vector<8x128xf32>
    %cst_113 = arith.constant 5.000000e-01 : f32
    %389 = vector.broadcast %cst_113 : f32 to vector<8x128xf32>
    %390 = arith.addf %388, %389 : vector<8x128xf32>
    %391 = vector.extract_strided_slice %390 {offsets = [0, 0], sizes = [8, 32], strides = [1, 1]} : vector<8x128xf32> to vector<8x32xf32>
    %392 = vector.extract_strided_slice %390 {offsets = [0, 32], sizes = [8, 32], strides = [1, 1]} : vector<8x128xf32> to vector<8x32xf32>
    %393 = vector.extract_strided_slice %390 {offsets = [0, 96], sizes = [8, 32], strides = [1, 1]} : vector<8x128xf32> to vector<8x32xf32>
    %394 = vector.extract_strided_slice %383 {offsets = [0, 64], sizes = [8, 32], strides = [1, 1]} : vector<8x128xf32> to vector<8x32xf32>
    %395 = math.tanh %394 : vector<8x32xf32>
    %396 = arith.mulf %392, %349 : vector<8x32xf32>
    %397 = arith.mulf %391, %395 : vector<8x32xf32>
    %398 = arith.addf %396, %397 : vector<8x32xf32>
    %399 = math.tanh %398 : vector<8x32xf32>
    %400 = arith.mulf %393, %399 : vector<8x32xf32>
    %401 = arith.truncf %400 : vector<8x32xf32> to vector<8x32xbf16>
    %c224 = arith.constant 224 : index
    %c0_114 = arith.constant 0 : index
    %402 = vector.load %arg7[%c224, %c0_114] : memref<256x10xbf16, #tpu.memory_space<vmem>>, vector<32x10xbf16>
    %cst_115 = arith.constant dense<0.000000e+00> : vector<8x10xf32>
    %403 = tpu.matmul %401, %402, %cst_115 {dimension_numbers = #tpu.dot_dimension_numbers<[1], [0], [0], [1], [0, 0, 1, 1], [], []>} : vector<8x32xbf16>, vector<32x10xbf16>, vector<8x10xf32> -> vector<8x10xf32>
    %404 = arith.addf %355, %403 : vector<8x10xf32>
    %405 = vector.extract_strided_slice %404 {offsets = [0, 0], sizes = [2, 10], strides = [1, 1]} : vector<8x10xf32> to vector<2x10xf32>
    %c0_116 = arith.constant 0 : index
    %c0_117 = arith.constant 0 : index
    %406 = vector.load %arg8[%c0_116, %c0_117] : memref<1x10xf32, #tpu.memory_space<vmem>>, vector<1x10xf32>
    %407 = vector.broadcast %406 : vector<1x10xf32> to vector<2x10xf32>
    %408 = arith.addf %405, %407 : vector<2x10xf32>
    %c0_118 = arith.constant 0 : index
    %c0_119 = arith.constant 0 : index
    %409 = vector.load %arg9[%c0_118, %c0_119] : memref<2x10xf32, #tpu.memory_space<vmem>>, vector<2x10xf32>
    tpu.vector_store %arg9[%c0_118, %c0_119], %408 {strides = array<i32>} : memref<2x10xf32, #tpu.memory_space<vmem>>, vector<2x10xf32>,
    return
  }
}

</mosaic_0001>

<bundles_post_ra>
// kernel: rnn_lstm_forward.1
= control target key start
LH: loop header
LB: loop body
LE: loop exit
PB: predicated region body
PF: predicated region fallthrough
CT: control target
= control target key end

     0   :  { %v2738_v1 = vmov 0.0   ;;  %vm77_vm0 = vcmask 130048   ;;  %vm2739_vm1 = vmmov 0   ;;  %v2740_v6 = vmov 0   ;;  %s3307_s0 = inlined_call_operand.vmem [shape: bf16[64,16], index: 0, kind: input, shape index: {}]   ;;  %s3308_s1 = inlined_call_operand.vmem [shape: bf16[16,128], index: 1, kind: input, shape index: {}]   ;;  %s3309_s2 = inlined_call_operand.vmem [shape: bf16[32,128], index: 2, kind: input, shape index: {}]   ;;  %s3310_s3 = inlined_call_operand.vmem [shape: f32[1,128], index: 3, kind: input, shape index: {}]   ;;  %s3311_s4 = inlined_call_operand.vmem [shape: bf16[32,128], index: 4, kind: input, shape index: {}]   ;;  %s3312_s5 = inlined_call_operand.vmem [shape: bf16[32,128], index: 5, kind: input, shape index: {}]   ;;  %s3313_s6 = inlined_call_operand.vmem [shape: f32[1,128], index: 6, kind: input, shape index: {}]   ;;  %s3314_s7 = inlined_call_operand.vmem [shape: bf16[256,10], index: 7, kind: input, shape index: {}]   ;;  %s3315_s8 = inlined_call_operand.vmem [shape: f32[1,10], index: 8, kind: input, shape index: {}]   ;;  %s3316_s9 = inlined_call_operand.hbm [shape: f32[2,10], index: 9, kind: output, shape index: {}]  }
   0x1   :  { %v2585_v0 = vld [vmem:[%s3308_s1] sm:$0xff]   ;;  %2323 = vmatprep.subr.bf16.mxu1 %v2738_v1  ;;  %v2801_v2 = vld [vmem:[%s3309_s2 + $0x8] sm:$0xff]   ;;  %2327 = vmatprep.mubr.msk.bf16.mxu1 %vm2739_vm1, %v2738_v1 }
   0x2   :  { %2313 = vmatprep.subr.bf16.mxu0 %v2585_v0  ;;  %v2587_v3 = vld [vmem:[%s3307_s0] sm:$0xff]   ;;  %2324 = vmatpush3.bf16.msra.mxu1 %v2801_v2  ;;  %v2588_v4 = vld [vmem:[%s3307_s0 + $0x8] sm:$0xff]  }
   0x3   :  { %2314 = vmatpush3.bf16.msra.mxu0 %v2585_v0  ;;  %2315 = vmatprep.mubr.msk.bf16.mxu0 %vm77_vm0, %v2587_v3  ;;  %v2815_v5 = vld [vmem:[%s3309_s2] sm:$0xff]  }
   0x4   :  { %2325 = vmatprep.subr.bf16.mxu1 %v2738_v1  ;;  %2339 = vmatprep.subr.bf16.mxu0 %v2738_v1 }
   0x6   :  { %2316 = vmatmul.mubr.msk.bf16.vlgmr.msra.gmra.mxu0 %vm77_vm0, %v2588_v4  ;;  %2326 = vmatpush3.bf16.msra.mxu1 %v2815_v5 }
   0x7   :  { %2331 = vmatprep.subr.bf16.mxu1 %v2738_v1 }
   0x9   :  { %2328 = vmatmul.mubr.bf16.vlgmr.msra.gmra.mxu1 %v2740_v6 }
   0xa   :  { %2335 = vmatprep.mubr.msk.bf16.mxu1 %vm2739_vm1, %v2738_v1 }
   0xb   :  { %14 = vsyncpa [#allocation4], 0  ;;  %v2830_v8 = vld [vmem:[%s3310_s3] ss:$0 sm:$0xff]  ;;  %s2741_s20 = smov 64   ;;  %s2742_s21 = smov 32  }
   0xc   :  { %v2841_v26 = vld [vmem:[%s3311_s4 + $0x8] sm:$0xff]   ;;  %v2591_v27 = vld [vmem:[%s3307_s0 + $0x10] sm:$0xff]   ;;  %v2592_v28 = vld [vmem:[%s3307_s0 + $0x18] sm:$0xff]   ;;  %vm189_vm2 = vcmask 261120   ;;  %vm2132_vm3 = vcmask 74752  }
   0xd   :  { %v2852_v29 = vld [vmem:[%s3312_s5 + $0x8] sm:$0xff]   ;;  %2332 = vmatpush3.bf16.msra.mxu1 %v2841_v26  ;;  %2319 = vmatprep.mubr.msk.bf16.mxu0 %vm77_vm0, %v2591_v27  ;;  %v2859_v30 = vld [vmem:[%s3311_s4] sm:$0xff]  }
   0xe   :  { %2320 = vmatmul.mubr.msk.bf16.gmra.mxu0 %vm77_vm0, %v2592_v28  ;;  %2333 = vmatprep.subr.bf16.mxu1 %v2738_v1  ;;  %v2867_v31 = vld [vmem:[%s3312_s5] sm:$0xff]  }
   0xf   :  { %2340 = vmatpush3.bf16.msra.mxu0 %v2852_v29  ;;  %2343 = vmatprep.mubr.msk.bf16.mxu0 %vm2739_vm1, %v2738_v1  ;;  %v2911_v47 = vld [vmem:[%s3313_s6] ss:$0 sm:$0xff] }
  0x10   :  { %2341 = vmatprep.subr.bf16.mxu0 %v2738_v1 }
  0x11   :  { %2334 = vmatpush3.bf16.msra.mxu1 %v2859_v30 }
  0x12   :  { %2347 = vmatprep.subr.bf16.mxu1 %v2738_v1 }
  0x13   :  { %2342 = vmatpush3.bf16.msra.mxu0 %v2867_v31 }
  0x14   :  { %2355 = vmatprep.subr.bf16.mxu0 %v2738_v1 }
  0x16   :  { %2344 = vmatmul.mubr.bf16.vlgmr.msra.gmra.mxu0 %v2740_v6 }
  0x17   :  { %2356 = vmatpush3.bf16.msra.mxu0 %v2841_v26  ;;  %2359 = vmatprep.mubr.msk.bf16.mxu0 %vm2739_vm1, %v2738_v1 }
  0x18   :  { %2357 = vmatprep.subr.bf16.mxu0 %v2738_v1 }
  0x1b   :  { %2358 = vmatpush3.bf16.msra.mxu0 %v2859_v30 }
  0x1c   :  { %2371 = vmatprep.subr.bf16.mxu0 %v2738_v1 }
  0xc6   :  { %v2825_v7 = vpop.f32.mrf.mxu0 }
  0xc8   :  { %v124_v9 = vpop.f32.mrf.mxu0 }
  0xc9   :  { %v125_v10 = vadd.f32 %v2830_v8, %v124_v9  ;;  %v227_v11 = vpop.f32.mrf.mxu1 }
  0xca   :  { %v2898_v37 = vpop.f32.mrf.mxu0 }
  0xcb   :  { %v233_v12 = vadd.f32 %v227_v11, %v125_v10  ;;  %v2329_v13 = vpop.f32.mrf.mxu1 }
  0xcc   :  { %v127_v38 = vpop.f32.mrf.mxu0 }
  0xcd   :  { %2612 = vtanh.f32 %v233_v12  ;;  %v230_v14 = vpop.f32.mrf.mxu1  ;;  %v234_v17 = vmul.f32 0.5, %v233_v12  ;;  %v128_v54 = vadd.f32 %v2830_v8, %v127_v38 }
  0xce   :  { %v2900_v39 = vpop.f32.mrf.mxu0 }
  0xcf   :  { %v2330_v15 = vpop.f32.mrf.mxu1  ;;  %2614 = vtanh.f32 %v234_v17 }
  0xd0   :  { %v2902_v40 = vpop.f32.mrf.mxu0 }
  0xd2   :  { %v2904_v41 = vpop.f32.mrf.mxu0 }
  0xd4   :  { %v2906_v42 = vpop.f32.mrf.mxu0 }
  0xd6   :  { %v367_v43 = vpop.f32.mrf.mxu0 }
  0xd8   :  { %v2345_v44 = vpop.f32.mrf.mxu0 }
  0xda   :  { %v2613_v16 = vpop.eup %2612  ;;  %v370_v45 = vpop.f32.mrf.mxu0 }
  0xdb   :  { %241 = vrot.lane.b32.xlu0 %v2613_v16, %s2741_s20 }
  0xdc   :  { %v2615_v18 = vpop.eup %2614  ;;  %v2346_v46 = vpop.f32.mrf.mxu0 }
  0xdd   :  { %v236_v19 = vmul.f32 0.5, %v2615_v18 }
  0xdf   :  { %v237_v20 = vadd.f32 0.5, %v236_v19 }
  0xe1   :  { %v239_v23 = vmul.f32 0.0, %v237_v20 }
 0x14d   :  { %v242_v21 = vpop.permute.xlu0 %241 }
 0x14e   :  { %v244_v22 = vmul.f32 %v242_v21, %v237_v20 }
 0x150   :  { %246 = vrot.lane.b32.xlu0 %v244_v22, %s2742_s21 }
 0x1c2   :  { %v247_v24 = vpop.permute.xlu0 %246 }
 0x1c3   :  { %v2835_v25 = vadd.f32 %v247_v24, %v239_v23 }
 0x1c5   :  { %2616 = vtanh.f32 %v2835_v25 }
 0x1d2   :  { %v2617_v32 = vpop.eup %2616 }
 0x1d3   :  { %252 = vrot.lane.b32.xlu1 %v2617_v32, %s2741_s20 }
 0x245   :  { %v253_v33 = vpop.permute.xlu1 %252 }
 0x246   :  { %v255_v34 = vmul.f32 %v253_v33, %v237_v20 }
 0x248   :  { %v256_v35 = vpack.c.bf16 %v255_v34, %v255_v34 }
 0x24a   :  { %264 = vrot.lane.b32.xlu1 %v256_v35, %s2742_s21  ;;  %v2597_v35 = vld [vmem:[%s3314_s7] sm:$0xff]  }
 0x2bc   :  { %v265_v36 = vpop.permute.xlu1 %264 }
 0x2bd   :  { %2336 = vmatmul.mubr.msk.bf16.vlgmr.msra.gmra.mxu1 %vm189_vm2, %v265_v36 }
 0x2be   :  { %2348 = vmatpush3.bf16.msra.mxu1 %v2801_v2  ;;  %2351 = vmatprep.mubr.msk.bf16.mxu1 %vm2739_vm1, %v2738_v1 }
 0x2bf   :  { %2349 = vmatprep.subr.bf16.mxu1 %v2738_v1 }
 0x2c2   :  { %2350 = vmatpush3.bf16.msra.mxu1 %v2815_v5 }
 0x2c3   :  { %2363 = vmatprep.subr.bf16.mxu1 %v2738_v1 }
 0x2c5   :  { %2352 = vmatmul.mubr.msk.bf16.vlgmr.msra.gmra.mxu1 %vm189_vm2, %v265_v36 }
 0x2c6   :  { %2364 = vmatpush3.bf16.msra.mxu1 %v2852_v29  ;;  %2367 = vmatprep.mubr.msk.bf16.mxu1 %vm2739_vm1, %v2738_v1 }
 0x2c7   :  { %2365 = vmatprep.subr.bf16.mxu1 %v2738_v1 }
 0x2ca   :  { %2366 = vmatpush3.bf16.msra.mxu1 %v2867_v31 }
 0x2cb   :  { %2379 = vmatprep.subr.bf16.mxu1 %v2738_v1 }
 0x37d   :  { %v315_v48 = vpop.f32.mrf.mxu1 }
 0x37e   :  { %v316_v49 = vadd.f32 %v2911_v47, %v315_v48 }
 0x37f   :  { %v2337_v50 = vpop.f32.mrf.mxu1 }
 0x380   :  { %v373_v51 = vadd.f32 %v367_v43, %v316_v49 }
 0x381   :  { %v318_v52 = vpop.f32.mrf.mxu1 }
 0x382   :  { %2618 = vtanh.f32 %v373_v51  ;;  %v374_v62 = vmul.f32 0.5, %v373_v51 }
 0x383   :  { %v2338_v53 = vpop.f32.mrf.mxu1 }
 0x385   :  { %v436_v55 = vpop.f32.mrf.mxu1 }
 0x386   :  { %v442_v56 = vadd.f32 %v436_v55, %v128_v54 }
 0x387   :  { %v2353_v57 = vpop.f32.mrf.mxu1 }
 0x388   :  { %2620 = vtanh.f32 %v442_v56  ;;  %v443_v63 = vmul.f32 0.5, %v442_v56 }
 0x389   :  { %v439_v58 = vpop.f32.mrf.mxu1  ;;  %2622 = vtanh.f32 %v374_v62 }
 0x38a   :  { %2624 = vtanh.f32 %v443_v63 }
 0x38b   :  { %v2354_v59 = vpop.f32.mrf.mxu1 }
 0x38f   :  { %v2619_v60 = vpop.eup %2618 }
 0x390   :  { %381 = vrot.lane.b32.xlu1 %v2619_v60, %s2741_s20 }
 0x395   :  { %v2621_v61 = vpop.eup %2620 }
 0x396   :  { %450 = vrot.lane.b32.xlu0 %v2621_v61, %s2741_s20  ;;  %v2623_v0 = vpop.eup %2622 }
 0x397   :  { %v376_v3 = vmul.f32 0.5, %v2623_v0  ;;  %v2625_v4 = vpop.eup %2624 }
 0x398   :  { %v445_v11 = vmul.f32 0.5, %v2625_v4 }
 0x399   :  { %v377_v6 = vadd.f32 0.5, %v376_v3 }
 0x39a   :  { %v446_v12 = vadd.f32 0.5, %v445_v11 }
 0x39b   :  { %v379_v15 = vmul.f32 0.0, %v377_v6 }
 0x39c   :  { %v448_v18 = vmul.f32 %v446_v12, %v2835_v25  ;;  %v2596_v25 = vld [vmem:[%s3314_s7 + $0x8] sm:$0xff]  }
 0x402   :  { %v382_v9 = vpop.permute.xlu1 %381 }
 0x403   :  { %v384_v10 = vmul.f32 %v382_v9, %v377_v6  ;;  %v2599_v9 = vld [vmem:[%s3314_s7 + $0x10] sm:$0xff]  }
 0x405   :  { %386 = vrot.lane.b32.xlu1 %v384_v10, %s2742_s21 }
 0x408   :  { %v451_v13 = vpop.permute.xlu0 %450 }
 0x409   :  { %v453_v14 = vmul.f32 %v451_v13, %v446_v12 }
 0x40b   :  { %455 = vrot.lane.b32.xlu0 %v453_v14, %s2742_s21 }
 0x477   :  { %v387_v16 = vpop.permute.xlu1 %386 }
 0x478   :  { %v389_v17 = vadd.f32 %v387_v16, %v379_v15 }
 0x47a   :  { %2626 = vtanh.f32 %v389_v17 }
 0x47d   :  { %v456_v19 = vpop.permute.xlu0 %455 }
 0x47e   :  { %v2920_v20 = vadd.f32 %v456_v19, %v448_v18  ;;  %v133_v19 = vadd.f32 %v2825_v7, %v2830_v8 }
 0x480   :  { %2628 = vtanh.f32 %v2920_v20 }
 0x487   :  { %v2627_v21 = vpop.eup %2626 }
 0x488   :  { %392 = vrot.lane.b32.xlu1 %v2627_v21, %s2741_s20 }
 0x48d   :  { %v2629_v22 = vpop.eup %2628 }
 0x48e   :  { %461 = vrot.lane.b32.xlu0 %v2629_v22, %s2741_s20 }
 0x4fa   :  { %v393_v23 = vpop.permute.xlu1 %392 }
 0x4fb   :  { %v395_v24 = vmul.f32 %v393_v23, %v377_v6  ;;  %v2598_v6 = vld [vmem:[%s3314_s7 + $0x18] sm:$0xff]  }
 0x4fd   :  { %v396_v27 = vpack.c.bf16 %v395_v24, %v395_v24 }
 0x4ff   :  { %513 = vrot.lane.b32.xlu1 %v396_v27, %s2742_s21 }
 0x500   :  { %v462_v28 = vpop.permute.xlu0 %461 }
 0x501   :  { %v464_v32 = vmul.f32 %v462_v28, %v446_v12 }
 0x503   :  { %v465_v33 = vpack.c.bf16 %v464_v32, %v464_v32 }
 0x505   :  { %467 = vrot.lane.b32.xlu0 %v465_v33, %s2742_s21 }
 0x571   :  { %v514_v34 = vpop.permute.xlu1 %513 }
 0x572   :  { %2368 = vmatmul.mubr.msk.bf16.vlgmr.msra.gmra.mxu1 %vm189_vm2, %v514_v34 }
 0x573   :  { %2380 = vmatpush3.bf16.msra.mxu1 %v2596_v25  ;;  %2383 = vmatprep.mubr.msk.bf16.mxu1 %vm2739_vm1, %v2738_v1 }
 0x574   :  { %2381 = vmatprep.subr.bf16.mxu1 %v2738_v1 }
 0x577   :  { %2382 = vmatpush3.bf16.msra.mxu1 %v2597_v35  ;;  %v468_v36 = vpop.permute.xlu0 %467 }
 0x578   :  { %2360 = vmatmul.mubr.msk.bf16.vlgmr.msra.gmra.mxu0 %vm189_vm2, %v468_v36  ;;  %2395 = vmatprep.subr.bf16.mxu1 %v2738_v1 }
 0x579   :  { %2375 = vmatprep.mubr.msk.bf16.mxu0 %vm2739_vm1, %v2738_v1  ;;  %2372 = vmatpush3.bf16.msra.mxu0 %v2598_v6 }
 0x57a   :  { %2384 = vmatmul.mubr.msk.bf16.vlgmr.msra.gmra.mxu1 %vm189_vm2, %v514_v34  ;;  %2373 = vmatprep.subr.bf16.mxu0 %v2738_v1 }
 0x57b   :  { %2396 = vmatpush3.bf16.msra.mxu1 %v2841_v26  ;;  %2399 = vmatprep.mubr.msk.bf16.mxu1 %vm2739_vm1, %v2738_v1 }
 0x57c   :  { %2397 = vmatprep.subr.bf16.mxu1 %v2738_v1 }
 0x57d   :  { %2374 = vmatpush3.bf16.msra.mxu0 %v2599_v9 }
 0x57e   :  { %2387 = vmatprep.subr.bf16.mxu0 %v2738_v1 }
 0x57f   :  { %2398 = vmatpush3.bf16.msra.mxu1 %v2859_v30 }
 0x580   :  { %2411 = vmatprep.subr.bf16.mxu1 %v2738_v1 }
 0x632   :  { %v552_v38 = vpop.f32.mrf.mxu1 }
 0x634   :  { %v2369_v43 = vpop.f32.mrf.mxu1 }
 0x636   :  { %v555_v44 = vpop.f32.mrf.mxu1 }
 0x638   :  { %v506_v45 = vpop.f32.mrf.mxu0  ;;  %v2370_v46 = vpop.f32.mrf.mxu1 }
 0x639   :  { %v507_v48 = vadd.f32 %v2911_v47, %v506_v45 }
 0x63a   :  { %v2361_v49 = vpop.f32.mrf.mxu0  ;;  %v2949_v50 = vpop.f32.mrf.mxu1 }
 0x63b   :  { %v558_v51 = vadd.f32 %v552_v38, %v507_v48 }
 0x63c   :  { %v509_v52 = vpop.f32.mrf.mxu0  ;;  %v2385_v53 = vpop.f32.mrf.mxu1 }
 0x63d   :  { %2630 = vtanh.f32 %v558_v51  ;;  %v559_v58 = vmul.f32 0.5, %v558_v51 }
 0x63e   :  { %v2362_v54 = vpop.f32.mrf.mxu0  ;;  %v693_v55 = vpop.f32.mrf.mxu1 }
 0x63f   :  { %2632 = vtanh.f32 %v559_v58 }
 0x640   :  { %v2386_v56 = vpop.f32.mrf.mxu1 }
 0x64a   :  { %v2631_v57 = vpop.eup %2630 }
 0x64b   :  { %566 = vrot.lane.b32.xlu0 %v2631_v57, %s2741_s20 }
 0x64c   :  { %v2633_v59 = vpop.eup %2632 }
 0x64d   :  { %v561_v60 = vmul.f32 0.5, %v2633_v59 }
 0x64f   :  { %v562_v61 = vadd.f32 0.5, %v561_v60 }
 0x651   :  { %v564_v0 = vmul.f32 %v562_v61, %v389_v17 }
 0x6bd   :  { %v567_v62 = vpop.permute.xlu0 %566 }
 0x6be   :  { %v569_v63 = vmul.f32 %v567_v62, %v562_v61 }
 0x6c0   :  { %571 = vrot.lane.b32.xlu1 %v569_v63, %s2742_s21 }
 0x732   :  { %v572_v3 = vpop.permute.xlu1 %571 }
 0x733   :  { %v2953_v4 = vadd.f32 %v572_v3, %v564_v0 }
 0x735   :  { %2634 = vtanh.f32 %v2953_v4 }
 0x742   :  { %v2635_v10 = vpop.eup %2634 }
 0x743   :  { %577 = vrot.lane.b32.xlu0 %v2635_v10, %s2741_s20 }
 0x7b5   :  { %v578_v11 = vpop.permute.xlu0 %577 }
 0x7b6   :  { %v580_v12 = vmul.f32 %v578_v11, %v562_v61 }
 0x7b8   :  { %v581_v13 = vpack.c.bf16 %v580_v12, %v580_v12 }
 0x7ba   :  { %587 = vrot.lane.b32.xlu1 %v581_v13, %s2742_s21 }
 0x82c   :  { %v588_v14 = vpop.permute.xlu1 %587 }
 0x82d   :  { %2376 = vmatmul.mubr.msk.bf16.vlgmr.msra.gmra.mxu0 %vm189_vm2, %v588_v14 }
 0x82e   :  { %2388 = vmatpush3.bf16.msra.mxu0 %v2801_v2  ;;  %2391 = vmatprep.mubr.msk.bf16.mxu0 %vm2739_vm1, %v2738_v1 }
 0x82f   :  { %2389 = vmatprep.subr.bf16.mxu0 %v2738_v1 }
 0x832   :  { %2390 = vmatpush3.bf16.msra.mxu0 %v2815_v5 }
 0x833   :  { %2403 = vmatprep.subr.bf16.mxu0 %v2738_v1 }
 0x835   :  { %2392 = vmatmul.mubr.msk.bf16.vlgmr.msra.gmra.mxu0 %vm189_vm2, %v468_v36 }
 0x836   :  { %2404 = vmatpush3.bf16.msra.mxu0 %v2852_v29  ;;  %2407 = vmatprep.mubr.msk.bf16.mxu0 %vm2739_vm1, %v2738_v1 }
 0x837   :  { %2405 = vmatprep.subr.bf16.mxu0 %v2738_v1 }
 0x83a   :  { %2406 = vmatpush3.bf16.msra.mxu0 %v2867_v31 }
 0x83b   :  { %2419 = vmatprep.subr.bf16.mxu0 %v2738_v1 }
 0x83d   :  { %2408 = vmatmul.mubr.msk.bf16.vlgmr.msra.gmra.mxu0 %vm189_vm2, %v588_v14 }
 0x83e   :  { %2420 = vmatpush3.bf16.msra.mxu0 %v2801_v2  ;;  %2423 = vmatprep.mubr.msk.bf16.mxu0 %vm2739_vm1, %v2738_v1 }
 0x83f   :  { %2421 = vmatprep.subr.bf16.mxu0 %v2738_v1 }
 0x842   :  { %2422 = vmatpush3.bf16.msra.mxu0 %v2815_v5 }
 0x843   :  { %2435 = vmatprep.subr.bf16.mxu0 %v2738_v1 }
 0x8ed   :  { %v2987_v15 = vpop.f32.mrf.mxu0 }
 0x8ef   :  { %v2377_v16 = vpop.f32.mrf.mxu0 }
 0x8f1   :  { %v641_v17 = vpop.f32.mrf.mxu0 }
 0x8f3   :  { %v2378_v18 = vpop.f32.mrf.mxu0 }
 0x8f5   :  { %v731_v21 = vpop.f32.mrf.mxu0 }
 0x8f6   :  { %v737_v22 = vadd.f32 %v731_v21, %v133_v19 }
 0x8f7   :  { %v2393_v23 = vpop.f32.mrf.mxu0 }
 0x8f8   :  { %2636 = vtanh.f32 %v737_v22  ;;  %v738_v35 = vmul.f32 0.5, %v737_v22 }
 0x8f9   :  { %v734_v24 = vpop.f32.mrf.mxu0 }
 0x8fa   :  { %2638 = vtanh.f32 %v738_v35 }
 0x8fb   :  { %v2394_v27 = vpop.f32.mrf.mxu0 }
 0x8fd   :  { %v841_v28 = vpop.f32.mrf.mxu0 }
 0x8ff   :  { %v2409_v32 = vpop.f32.mrf.mxu0 }
 0x901   :  { %v844_v33 = vpop.f32.mrf.mxu0 }
 0x903   :  { %v2410_v25 = vpop.f32.mrf.mxu0 }
 0x904   :  { %v2600_v25 = vld [vmem:[%s3314_s7 + $0x28] sm:$0xff]  }
 0x905   :  { %v2637_v34 = vpop.eup %2636 }
 0x906   :  { %745 = vrot.lane.b32.xlu0 %v2637_v34, %s2741_s20  ;;  %v2601_v34 = vld [vmem:[%s3314_s7 + $0x20] sm:$0xff]  }
 0x907   :  { %v2639_v36 = vpop.eup %2638 }
 0x908   :  { %v740_v38 = vmul.f32 0.5, %v2639_v36 }
 0x90a   :  { %v741_v43 = vadd.f32 0.5, %v740_v38 }
 0x90c   :  { %v743_v45 = vmul.f32 %v741_v43, %v2920_v20  ;;  %v136_v20 = vadd.f32 %v2898_v37, %v2830_v8 }
 0x978   :  { %v746_v44 = vpop.permute.xlu0 %745 }
 0x979   :  { %v748_v7 = vmul.f32 %v746_v44, %v741_v43 }
 0x97b   :  { %750 = vrot.lane.b32.xlu1 %v748_v7, %s2742_s21 }
 0x9ed   :  { %v751_v46 = vpop.permute.xlu1 %750 }
 0x9ee   :  { %v753_v48 = vadd.f32 %v751_v46, %v743_v45 }
 0x9f0   :  { %2640 = vtanh.f32 %v753_v48 }
 0x9fd   :  { %v2641_v49 = vpop.eup %2640 }
 0x9fe   :  { %756 = vrot.lane.b32.xlu0 %v2641_v49, %s2741_s20  ;;  %v691_v49 = vadd.f32 %v2949_v50, %v2987_v15 }
 0xa70   :  { %v757_v51 = vpop.permute.xlu0 %756 }
 0xa71   :  { %v759_v52 = vmul.f32 %v757_v51, %v741_v43 }
 0xa73   :  { %v760_v53 = vpack.c.bf16 %v759_v52, %v759_v52 }
 0xa75   :  { %762 = vrot.lane.b32.xlu1 %v760_v53, %s2742_s21 }
 0xae7   :  { %v763_v54 = vpop.permute.xlu1 %762 }
 0xae8   :  { %2400 = vmatmul.mubr.msk.bf16.vlgmr.msra.gmra.mxu1 %vm189_vm2, %v763_v54  ;;  %2424 = vmatmul.mubr.msk.bf16.vlgmr.msra.gmra.mxu0 %vm189_vm2, %v763_v54 }
 0xae9   :  { %2436 = vmatpush3.bf16.msra.mxu0 %v2852_v29  ;;  %2415 = vmatprep.mubr.msk.bf16.mxu1 %vm2739_vm1, %v2738_v1 }
 0xaea   :  { %2437 = vmatprep.subr.bf16.mxu0 %v2738_v1  ;;  %2439 = vmatprep.mubr.msk.bf16.mxu0 %vm2739_vm1, %v2738_v1 }
 0xaeb   :  { %2412 = vmatpush3.bf16.msra.mxu1 %v2600_v25 }
 0xaec   :  { %2413 = vmatprep.subr.bf16.mxu1 %v2738_v1 }
 0xaed   :  { %2438 = vmatpush3.bf16.msra.mxu0 %v2867_v31 }
 0xaee   :  { %2451 = vmatprep.subr.bf16.mxu0 %v2738_v1 }
 0xaef   :  { %2414 = vmatpush3.bf16.msra.mxu1 %v2601_v34 }
 0xaf0   :  { %2427 = vmatprep.subr.bf16.mxu1 %v2738_v1 }
 0xba8   :  { %v801_v55 = vpop.f32.mrf.mxu1  ;;  %v969_v56 = vpop.f32.mrf.mxu0 }
 0xba9   :  { %v802_v57 = vadd.f32 %v2911_v47, %v801_v55  ;;  %v975_v58 = vadd.f32 %v969_v56, %v136_v20 }
 0xbaa   :  { %v2401_v59 = vpop.f32.mrf.mxu1  ;;  %v2425_v60 = vpop.f32.mrf.mxu0 }
 0xbab   :  { %v847_v61 = vadd.f32 %v841_v28, %v802_v57  ;;  %2642 = vtanh.f32 %v975_v58  ;;  %v976_v37 = vmul.f32 0.5, %v975_v58  ;;  %v141_v59 = vadd.f32 %v2830_v8, %v2902_v40 }
 0xbac   :  { %v804_v62 = vpop.f32.mrf.mxu1  ;;  %v972_v63 = vpop.f32.mrf.mxu0 }
 0xbad   :  { %2644 = vtanh.f32 %v847_v61  ;;  %v848_v10 = vmul.f32 0.5, %v847_v61 }
 0xbae   :  { %v2402_v0 = vpop.f32.mrf.mxu1  ;;  %v2426_v3 = vpop.f32.mrf.mxu0  ;;  %2646 = vtanh.f32 %v976_v37 }
 0xbaf   :  { %2648 = vtanh.f32 %v848_v10 }
 0xbb8   :  { %v2643_v6 = vpop.eup %2642 }
 0xbb9   :  { %983 = vrot.lane.b32.xlu1 %v2643_v6, %s2741_s20 }
 0xbba   :  { %v2645_v9 = vpop.eup %2644 }
 0xbbb   :  { %855 = vrot.lane.b32.xlu0 %v2645_v9, %s2741_s20  ;;  %v2647_v11 = vpop.eup %2646 }
 0xbbc   :  { %v2649_v12 = vpop.eup %2648  ;;  %v978_v13 = vmul.f32 0.5, %v2647_v11 }
 0xbbd   :  { %v850_v14 = vmul.f32 0.5, %v2649_v12 }
 0xbbe   :  { %v979_v16 = vadd.f32 0.5, %v978_v13 }
 0xbbf   :  { %v851_v19 = vadd.f32 0.5, %v850_v14 }
 0xbc0   :  { %v981_v23 = vmul.f32 %v979_v16, %v753_v48 }
 0xbc1   :  { %v853_v28 = vmul.f32 %v851_v19, %v2953_v4 }
 0xc2b   :  { %v984_v17 = vpop.permute.xlu1 %983 }
 0xc2c   :  { %v986_v18 = vmul.f32 %v984_v17, %v979_v16 }
 0xc2d   :  { %v856_v21 = vpop.permute.xlu0 %855 }
 0xc2e   :  { %v858_v22 = vmul.f32 %v856_v21, %v851_v19  ;;  %988 = vrot.lane.b32.xlu1 %v986_v18, %s2742_s21 }
 0xc30   :  { %860 = vrot.lane.b32.xlu0 %v858_v22, %s2742_s21 }
 0xca0   :  { %v989_v24 = vpop.permute.xlu1 %988 }
 0xca1   :  { %v3013_v27 = vadd.f32 %v989_v24, %v981_v23 }
 0xca2   :  { %v861_v32 = vpop.permute.xlu0 %860 }
 0xca3   :  { %2650 = vtanh.f32 %v3013_v27  ;;  %v3017_v33 = vadd.f32 %v861_v32, %v853_v28 }
 0xca5   :  { %2652 = vtanh.f32 %v3017_v33 }
 0xcb0   :  { %v2651_v35 = vpop.eup %2650 }
 0xcb1   :  { %994 = vrot.lane.b32.xlu1 %v2651_v35, %s2741_s20 }
 0xcb2   :  { %v2653_v4 = vpop.eup %2652 }
 0xcb3   :  { %866 = vrot.lane.b32.xlu0 %v2653_v4, %s2741_s20 }
 0xd23   :  { %v995_v36 = vpop.permute.xlu1 %994 }
 0xd24   :  { %v997_v38 = vmul.f32 %v995_v36, %v979_v16  ;;  %v2602_v36 = vld [vmem:[%s3314_s7 + $0x38] sm:$0xff]  }
 0xd25   :  { %v867_v43 = vpop.permute.xlu0 %866 }
 0xd26   :  { %v998_v44 = vpack.c.bf16 %v997_v38, %v997_v38  ;;  %v869_v7 = vmul.f32 %v867_v43, %v851_v19 }
 0xd28   :  { %v870_v45 = vpack.c.bf16 %v869_v7, %v869_v7  ;;  %1000 = vrot.lane.b32.xlu1 %v998_v44, %s2742_s21 }
 0xd2a   :  { %876 = vrot.lane.b32.xlu0 %v870_v45, %s2742_s21 }
 0xd9a   :  { %v1001_v48 = vpop.permute.xlu1 %1000 }
 0xd9c   :  { %v877_v46 = vpop.permute.xlu0 %876 }
 0xd9d   :  { %2416 = vmatmul.mubr.msk.bf16.vlgmr.msra.gmra.mxu1 %vm189_vm2, %v877_v46  ;;  %2440 = vmatmul.mubr.msk.bf16.vlgmr.msra.gmra.mxu0 %vm189_vm2, %v877_v46 }
 0xd9e   :  { %2428 = vmatpush3.bf16.msra.mxu1 %v2841_v26  ;;  %2452 = vmatpush3.bf16.msra.mxu0 %v2801_v2 }
 0xd9f   :  { %2429 = vmatprep.subr.bf16.mxu1 %v2738_v1  ;;  %2453 = vmatprep.subr.bf16.mxu0 %v2738_v1 }
 0xda0   :  { %2431 = vmatprep.mubr.msk.bf16.mxu1 %vm2739_vm1, %v2738_v1  ;;  %2455 = vmatprep.mubr.msk.bf16.mxu0 %vm2739_vm1, %v2738_v1 }
 0xda2   :  { %2430 = vmatpush3.bf16.msra.mxu1 %v2859_v30  ;;  %2454 = vmatpush3.bf16.msra.mxu0 %v2815_v5 }
 0xda3   :  { %2443 = vmatprep.subr.bf16.mxu1 %v2738_v1  ;;  %2467 = vmatprep.subr.bf16.mxu0 %v2738_v1 }
 0xda5   :  { %2432 = vmatmul.mubr.msk.bf16.vlgmr.msra.gmra.mxu1 %vm189_vm2, %v1001_v48  ;;  %2456 = vmatmul.mubr.msk.bf16.vlgmr.msra.gmra.mxu0 %vm189_vm2, %v1001_v48 }
 0xda6   :  { %2468 = vmatpush3.bf16.msra.mxu0 %v2852_v29  ;;  %2447 = vmatprep.mubr.msk.bf16.mxu1 %vm2739_vm1, %v2738_v1 }
 0xda7   :  { %2469 = vmatprep.subr.bf16.mxu0 %v2738_v1  ;;  %2471 = vmatprep.mubr.msk.bf16.mxu0 %vm2739_vm1, %v2738_v1 }
 0xda8   :  { %2444 = vmatpush3.bf16.msra.mxu1 %v2602_v36 }
 0xda9   :  { %2445 = vmatprep.subr.bf16.mxu1 %v2738_v1 }
 0xdaa   :  { %2470 = vmatpush3.bf16.msra.mxu0 %v2867_v31 }
 0xdab   :  { %2483 = vmatprep.subr.bf16.mxu0 %v2738_v1 }
 0xe5d   :  { %v927_v51 = vpop.f32.mrf.mxu1  ;;  %v1079_v52 = vpop.f32.mrf.mxu0 }
 0xe5e   :  { %v3058_v53 = vadd.f32 %v927_v51, %v691_v49 }
 0xe5f   :  { %v2417_v54 = vpop.f32.mrf.mxu1  ;;  %v2441_v20 = vpop.f32.mrf.mxu0 }
 0xe61   :  { %v930_v55 = vpop.f32.mrf.mxu1  ;;  %v1082_v56 = vpop.f32.mrf.mxu0 }
 0xe63   :  { %v2418_v57 = vpop.f32.mrf.mxu1  ;;  %v2442_v58 = vpop.f32.mrf.mxu0 }
 0xe65   :  { %v1039_v60 = vpop.f32.mrf.mxu1  ;;  %v1207_v61 = vpop.f32.mrf.mxu0 }
 0xe66   :  { %v1040_v62 = vadd.f32 %v2911_v47, %v1039_v60  ;;  %v1213_v63 = vadd.f32 %v1207_v61, %v141_v59  ;;  %v144_v59 = vadd.f32 %v2830_v8, %v2906_v42 }
 0xe67   :  { %v2433_v0 = vpop.f32.mrf.mxu1  ;;  %v2457_v50 = vpop.f32.mrf.mxu0 }
 0xe68   :  { %v1085_v15 = vadd.f32 %v1079_v52, %v1040_v62  ;;  %2654 = vtanh.f32 %v1213_v63  ;;  %v1214_v40 = vmul.f32 0.5, %v1213_v63 }
 0xe69   :  { %v1042_v3 = vpop.f32.mrf.mxu1  ;;  %v1210_v6 = vpop.f32.mrf.mxu0 }
 0xe6a   :  { %2656 = vtanh.f32 %v1085_v15  ;;  %v1086_v12 = vmul.f32 0.5, %v1085_v15 }
 0xe6b   :  { %v2434_v9 = vpop.f32.mrf.mxu1  ;;  %v2458_v37 = vpop.f32.mrf.mxu0  ;;  %2658 = vtanh.f32 %v1214_v40 }
 0xe6c   :  { %2660 = vtanh.f32 %v1086_v12 }
 0xe75   :  { %v2655_v10 = vpop.eup %2654 }
 0xe76   :  { %1221 = vrot.lane.b32.xlu1 %v2655_v10, %s2741_s20 }
 0xe77   :  { %v2657_v11 = vpop.eup %2656 }
 0xe78   :  { %1093 = vrot.lane.b32.xlu0 %v2657_v11, %s2741_s20  ;;  %v2659_v13 = vpop.eup %2658 }
 0xe79   :  { %v2661_v14 = vpop.eup %2660  ;;  %v1216_v16 = vmul.f32 0.5, %v2659_v13 }
 0xe7a   :  { %v1088_v17 = vmul.f32 0.5, %v2661_v14 }
 0xe7b   :  { %v1217_v18 = vadd.f32 0.5, %v1216_v16 }
 0xe7c   :  { %v1089_v22 = vadd.f32 0.5, %v1088_v17 }
 0xe7d   :  { %v1219_v28 = vmul.f32 %v1217_v18, %v3013_v27  ;;  %v2603_v27 = vld [vmem:[%s3314_s7 + $0x30] sm:$0xff]  }
 0xe7e   :  { %v1091_v34 = vmul.f32 %v1089_v22, %v3017_v33  ;;  %2446 = vmatpush3.bf16.msra.mxu1 %v2603_v27 }
 0xe7f   :  { %2459 = vmatprep.subr.bf16.mxu1 %v2738_v1 }
 0xee8   :  { %v1222_v19 = vpop.permute.xlu1 %1221 }
 0xee9   :  { %v1224_v21 = vmul.f32 %v1222_v19, %v1217_v18 }
 0xeea   :  { %v1094_v23 = vpop.permute.xlu0 %1093 }
 0xeeb   :  { %v1096_v24 = vmul.f32 %v1094_v23, %v1089_v22  ;;  %1226 = vrot.lane.b32.xlu1 %v1224_v21, %s2742_s21 }
 0xeed   :  { %1098 = vrot.lane.b32.xlu0 %v1096_v24, %s2742_s21 }
 0xf5d   :  { %v1227_v32 = vpop.permute.xlu1 %1226 }
 0xf5e   :  { %v3068_v25 = vadd.f32 %v1227_v32, %v1219_v28 }
 0xf5f   :  { %v1099_v35 = vpop.permute.xlu0 %1098 }
 0xf60   :  { %2662 = vtanh.f32 %v3068_v25  ;;  %v3072_v4 = vadd.f32 %v1099_v35, %v1091_v34  ;;  %v2604_v35 = vld [vmem:[%s3314_s7 + $0x48] sm:$0xff]  }
 0xf62   :  { %2664 = vtanh.f32 %v3072_v4 }
 0xf6d   :  { %v2663_v38 = vpop.eup %2662 }
 0xf6e   :  { %1232 = vrot.lane.b32.xlu1 %v2663_v38, %s2741_s20 }
 0xf6f   :  { %v2665_v33 = vpop.eup %2664 }
 0xf70   :  { %1104 = vrot.lane.b32.xlu0 %v2665_v33, %s2741_s20 }
 0xfe0   :  { %v1233_v43 = vpop.permute.xlu1 %1232 }
 0xfe1   :  { %v1235_v44 = vmul.f32 %v1233_v43, %v1217_v18 }
 0xfe2   :  { %v1105_v7 = vpop.permute.xlu0 %1104 }
 0xfe3   :  { %v1236_v45 = vpack.c.bf16 %v1235_v44, %v1235_v44  ;;  %v1107_v46 = vmul.f32 %v1105_v7, %v1089_v22 }
 0xfe5   :  { %v1108_v48 = vpack.c.bf16 %v1107_v46, %v1107_v46  ;;  %1238 = vrot.lane.b32.xlu1 %v1236_v45, %s2742_s21  ;;  %v3147_v46 = vld [vmem:[%s3309_s2 + $0x8] sm:$0xff]  }
 0xfe7   :  { %1114 = vrot.lane.b32.xlu0 %v1108_v48, %s2742_s21 }
0x1057   :  { %v1239_v51 = vpop.permute.xlu1 %1238 }
0x1059   :  { %v1115_v49 = vpop.permute.xlu0 %1114 }
0x105a   :  { %2448 = vmatmul.mubr.msk.bf16.vlgmr.msra.gmra.mxu1 %vm189_vm2, %v1115_v49  ;;  %2472 = vmatmul.mubr.msk.bf16.vlgmr.msra.gmra.mxu0 %vm189_vm2, %v1115_v49 }
0x105b   :  { %2460 = vmatpush3.bf16.msra.mxu1 %v2841_v26  ;;  %2484 = vmatpush3.bf16.msra.mxu0 %v2801_v2 }
0x105c   :  { %2461 = vmatprep.subr.bf16.mxu1 %v2738_v1  ;;  %2485 = vmatprep.subr.bf16.mxu0 %v2738_v1 }
0x105d   :  { %2463 = vmatprep.mubr.msk.bf16.mxu1 %vm2739_vm1, %v2738_v1  ;;  %2487 = vmatprep.mubr.msk.bf16.mxu0 %vm2739_vm1, %v2738_v1 }
0x105f   :  { %2462 = vmatpush3.bf16.msra.mxu1 %v2859_v30  ;;  %2486 = vmatpush3.bf16.msra.mxu0 %v2815_v5 }
0x1060   :  { %2475 = vmatprep.subr.bf16.mxu1 %v2738_v1  ;;  %2499 = vmatprep.subr.bf16.mxu0 %v2738_v1 }
0x1062   :  { %2464 = vmatmul.mubr.msk.bf16.vlgmr.msra.gmra.mxu1 %vm189_vm2, %v1239_v51  ;;  %2488 = vmatmul.mubr.msk.bf16.vlgmr.msra.gmra.mxu0 %vm189_vm2, %v1239_v51 }
0x1063   :  { %2500 = vmatpush3.bf16.msra.mxu0 %v2852_v29  ;;  %2479 = vmatprep.mubr.msk.bf16.mxu1 %vm2739_vm1, %v2738_v1 }
0x1064   :  { %2501 = vmatprep.subr.bf16.mxu0 %v2738_v1  ;;  %2503 = vmatprep.mubr.msk.bf16.mxu0 %vm2739_vm1, %v2738_v1 }
0x1065   :  { %2476 = vmatpush3.bf16.msra.mxu1 %v2604_v35 }
0x1066   :  { %2477 = vmatprep.subr.bf16.mxu1 %v2738_v1 }
0x1067   :  { %2502 = vmatpush3.bf16.msra.mxu0 %v2867_v31 }
0x1068   :  { %2515 = vmatprep.subr.bf16.mxu0 %v2738_v1 }
0x111a   :  { %v1165_v2 = vpop.f32.mrf.mxu1  ;;  %v1317_v5 = vpop.f32.mrf.mxu0 }
0x111b   :  { %v3112_v52 = vadd.f32 %v1165_v2, %v3058_v53 }
0x111c   :  { %v2449_v54 = vpop.f32.mrf.mxu1  ;;  %v2473_v20 = vpop.f32.mrf.mxu0 }
0x111e   :  { %v1168_v55 = vpop.f32.mrf.mxu1  ;;  %v1320_v56 = vpop.f32.mrf.mxu0 }
0x111f   :  { %v3181_v56 = vld [vmem:[%s3310_s3] ss:$0 sm:$0xff] }
0x1120   :  { %v2450_v57 = vpop.f32.mrf.mxu1  ;;  %v2474_v58 = vpop.f32.mrf.mxu0 }
0x1122   :  { %v1277_v60 = vpop.f32.mrf.mxu1  ;;  %v1445_v61 = vpop.f32.mrf.mxu0 }
0x1123   :  { %v1278_v62 = vadd.f32 %v2911_v47, %v1277_v60  ;;  %v1451_v63 = vadd.f32 %v1445_v61, %v144_v59 }
0x1124   :  { %v2465_v0 = vpop.f32.mrf.mxu1  ;;  %v2489_v50 = vpop.f32.mrf.mxu0 }
0x1125   :  { %v1323_v15 = vadd.f32 %v1317_v5, %v1278_v62  ;;  %2666 = vtanh.f32 %v1451_v63  ;;  %v1452_v8 = vmul.f32 0.5, %v1451_v63 }
0x1126   :  { %v1280_v53 = vpop.f32.mrf.mxu1  ;;  %v1448_v3 = vpop.f32.mrf.mxu0 }
0x1127   :  { %2668 = vtanh.f32 %v1323_v15  ;;  %v1324_v42 = vmul.f32 0.5, %v1323_v15 }
0x1128   :  { %v2466_v6 = vpop.f32.mrf.mxu1  ;;  %v2490_v9 = vpop.f32.mrf.mxu0  ;;  %2670 = vtanh.f32 %v1452_v8 }
0x1129   :  { %2672 = vtanh.f32 %v1324_v42 }
0x1132   :  { %v2667_v37 = vpop.eup %2666 }
0x1133   :  { %1459 = vrot.lane.b32.xlu1 %v2667_v37, %s2741_s20 }
0x1134   :  { %v2669_v10 = vpop.eup %2668 }
0x1135   :  { %1331 = vrot.lane.b32.xlu0 %v2669_v10, %s2741_s20  ;;  %v2671_v11 = vpop.eup %2670 }
0x1136   :  { %v2673_v40 = vpop.eup %2672  ;;  %v1454_v12 = vmul.f32 0.5, %v2671_v11 }
0x1137   :  { %v1326_v13 = vmul.f32 0.5, %v2673_v40 }
0x1138   :  { %v1455_v14 = vadd.f32 0.5, %v1454_v12 }
0x1139   :  { %v1327_v18 = vadd.f32 0.5, %v1326_v13 }
0x113a   :  { %v1457_v22 = vmul.f32 %v1455_v14, %v3068_v25  ;;  %v2605_v25 = vld [vmem:[%s3314_s7 + $0x40] sm:$0xff]  }
0x113b   :  { %v1329_v28 = vmul.f32 %v1327_v18, %v3072_v4  ;;  %2478 = vmatpush3.bf16.msra.mxu1 %v2605_v25 }
0x113c   :  { %2491 = vmatprep.subr.bf16.mxu1 %v2738_v1 }
0x11a5   :  { %v1460_v16 = vpop.permute.xlu1 %1459 }
0x11a6   :  { %v1462_v17 = vmul.f32 %v1460_v16, %v1455_v14 }
0x11a7   :  { %v1332_v19 = vpop.permute.xlu0 %1331 }
0x11a8   :  { %v1334_v21 = vmul.f32 %v1332_v19, %v1327_v18  ;;  %1464 = vrot.lane.b32.xlu1 %v1462_v17, %s2742_s21 }
0x11aa   :  { %1336 = vrot.lane.b32.xlu0 %v1334_v21, %s2742_s21 }
0x121a   :  { %v1465_v23 = vpop.permute.xlu1 %1464 }
0x121b   :  { %v3122_v24 = vadd.f32 %v1465_v23, %v1457_v22  ;;  %v2606_v22 = vld [vmem:[%s3314_s7 + $0x58] sm:$0xff]   ;;  %v2607_v23 = vld [vmem:[%s3314_s7 + $0x50] sm:$0xff]  }
0x121c   :  { %v1337_v32 = vpop.permute.xlu0 %1336 }
0x121d   :  { %2674 = vtanh.f32 %v3122_v24  ;;  %v3126_v34 = vadd.f32 %v1337_v32, %v1329_v28 }
0x121f   :  { %2676 = vtanh.f32 %v3126_v34 }
0x122a   :  { %v2675_v36 = vpop.eup %2674 }
0x122b   :  { %1470 = vrot.lane.b32.xlu1 %v2675_v36, %s2741_s20 }
0x122c   :  { %v2677_v4 = vpop.eup %2676 }
0x122d   :  { %1342 = vrot.lane.b32.xlu0 %v2677_v4, %s2741_s20 }
0x129d   :  { %v1471_v27 = vpop.permute.xlu1 %1470 }
0x129e   :  { %v1473_v38 = vmul.f32 %v1471_v27, %v1455_v14 }
0x129f   :  { %v1343_v33 = vpop.permute.xlu0 %1342 }
0x12a0   :  { %v1474_v43 = vpack.c.bf16 %v1473_v38, %v1473_v38  ;;  %v1345_v44 = vmul.f32 %v1343_v33, %v1327_v18  ;;  %v3215_v38 = vld [vmem:[%s3311_s4 + $0x8] sm:$0xff]   ;;  %v3228_v33 = vld [vmem:[%s3311_s4] sm:$0xff]  }
0x12a2   :  { %v1346_v7 = vpack.c.bf16 %v1345_v44, %v1345_v44  ;;  %1476 = vrot.lane.b32.xlu1 %v1474_v43, %s2742_s21  ;;  %v2713_v44 = vld [vmem:[%s3312_s5 + $0x8] sm:$0xff]  }
0x12a4   :  { %1352 = vrot.lane.b32.xlu0 %v1346_v7, %s2742_s21  ;;  %v2714_v7 = vld [vmem:[%s3312_s5] sm:$0xff]  }
0x1314   :  { %v1477_v48 = vpop.permute.xlu1 %1476 }
0x1316   :  { %v1353_v45 = vpop.permute.xlu0 %1352 }
0x1317   :  { %2480 = vmatmul.mubr.msk.bf16.vlgmr.msra.gmra.mxu1 %vm189_vm2, %v1353_v45  ;;  %2504 = vmatmul.mubr.msk.bf16.vlgmr.msra.gmra.mxu0 %vm189_vm2, %v1353_v45 }
0x1318   :  { %2492 = vmatpush3.bf16.msra.mxu1 %v2841_v26  ;;  %2516 = vmatpush3.bf16.msra.mxu0 %v3147_v46  ;;  %v3160_v26 = vld [vmem:[%s3309_s2] sm:$0xff]  }
0x1319   :  { %2493 = vmatprep.subr.bf16.mxu1 %v2738_v1  ;;  %2517 = vmatprep.subr.bf16.mxu0 %v2738_v1 }
0x131a   :  { %2495 = vmatprep.mubr.msk.bf16.mxu1 %vm2739_vm1, %v2738_v1  ;;  %2519 = vmatprep.mubr.msk.bf16.mxu0 %vm2739_vm1, %v2738_v1 }
0x131c   :  { %2494 = vmatpush3.bf16.msra.mxu1 %v2859_v30  ;;  %2518 = vmatpush3.bf16.msra.mxu0 %v3160_v26 }
0x131d   :  { %2507 = vmatprep.subr.bf16.mxu1 %v2738_v1  ;;  %2531 = vmatprep.subr.bf16.mxu0 %v2738_v1 }
0x131f   :  { %2496 = vmatmul.mubr.msk.bf16.vlgmr.msra.gmra.mxu1 %vm189_vm2, %v1477_v48  ;;  %2520 = vmatmul.mubr.msk.bf16.vlgmr.msra.gmra.mxu0 %vm189_vm2, %v1477_v48 }
0x1320   :  { %2532 = vmatpush3.bf16.msra.mxu0 %v2852_v29  ;;  %2511 = vmatprep.mubr.msk.bf16.mxu1 %vm2739_vm1, %v2738_v1 }
0x1321   :  { %2533 = vmatprep.subr.bf16.mxu0 %v2738_v1  ;;  %2535 = vmatprep.mubr.msk.bf16.mxu0 %vm2739_vm1, %v2738_v1 }
0x1322   :  { %2508 = vmatpush3.bf16.msra.mxu1 %v2606_v22 }
0x1323   :  { %2509 = vmatprep.subr.bf16.mxu1 %v2738_v1 }
0x1324   :  { %2534 = vmatpush3.bf16.msra.mxu0 %v2867_v31  ;;  %v149_v31 = vadd.f32 %v3181_v56, %v2900_v39 }
0x1325   :  { %2547 = vmatprep.subr.bf16.mxu0 %v2738_v1 }
0x1326   :  { %2510 = vmatpush3.bf16.msra.mxu1 %v2607_v23 }
0x1327   :  { %2523 = vmatprep.subr.bf16.mxu1 %v2738_v1 }
0x13d7   :  { %v1403_v30 = vpop.f32.mrf.mxu1  ;;  %v1555_v49 = vpop.f32.mrf.mxu0 }
0x13d8   :  { %v3176_v51 = vadd.f32 %v1403_v30, %v3112_v52 }
0x13d9   :  { %v2481_v2 = vpop.f32.mrf.mxu1  ;;  %v2505_v5 = vpop.f32.mrf.mxu0 }
0x13db   :  { %v1406_v29 = vpop.f32.mrf.mxu1  ;;  %v1558_v54 = vpop.f32.mrf.mxu0 }
0x13dc   :  { %v152_v54 = vadd.f32 %v3181_v56, %v2904_v41 }
0x13dd   :  { %v2482_v20 = vpop.f32.mrf.mxu1  ;;  %v2506_v55 = vpop.f32.mrf.mxu0 }
0x13df   :  { %v1515_v57 = vpop.f32.mrf.mxu1  ;;  %v1683_v58 = vpop.f32.mrf.mxu0 }
0x13e0   :  { %v1516_v59 = vadd.f32 %v2911_v47, %v1515_v57  ;;  %v1689_v52 = vadd.f32 %v1683_v58, %v149_v31  ;;  %v3255_v31 = vld [vmem:[%s3313_s6] ss:$0 sm:$0xff] }
0x13e1   :  { %v2497_v60 = vpop.f32.mrf.mxu1  ;;  %v2521_v61 = vpop.f32.mrf.mxu0 }
0x13e2   :  { %v1561_v62 = vadd.f32 %v1555_v49, %v1516_v59  ;;  %2678 = vtanh.f32 %v1689_v52  ;;  %v1690_v39 = vmul.f32 0.5, %v1689_v52 }
0x13e3   :  { %v1518_v63 = vpop.f32.mrf.mxu1  ;;  %v1686_v0 = vpop.f32.mrf.mxu0 }
0x13e4   :  { %2680 = vtanh.f32 %v1561_v62  ;;  %v1562_v6 = vmul.f32 0.5, %v1561_v62 }
0x13e5   :  { %v2498_v50 = vpop.f32.mrf.mxu1  ;;  %v2522_v15 = vpop.f32.mrf.mxu0  ;;  %2682 = vtanh.f32 %v1690_v39 }
0x13e6   :  { %2684 = vtanh.f32 %v1562_v6 }
0x13ef   :  { %v2679_v53 = vpop.eup %2678 }
0x13f0   :  { %1697 = vrot.lane.b32.xlu1 %v2679_v53, %s2741_s20 }
0x13f1   :  { %v2681_v3 = vpop.eup %2680 }
0x13f2   :  { %1569 = vrot.lane.b32.xlu0 %v2681_v3, %s2741_s20  ;;  %v2683_v47 = vpop.eup %2682 }
0x13f3   :  { %v2685_v9 = vpop.eup %2684  ;;  %v1692_v37 = vmul.f32 0.5, %v2683_v47 }
0x13f4   :  { %v1564_v10 = vmul.f32 0.5, %v2685_v9 }
0x13f5   :  { %v1693_v8 = vadd.f32 0.5, %v1692_v37 }
0x13f6   :  { %v1565_v40 = vadd.f32 0.5, %v1564_v10 }
0x13f7   :  { %v1695_v14 = vmul.f32 %v1693_v8, %v3122_v24 }
0x13f8   :  { %v1567_v18 = vmul.f32 %v1565_v40, %v3126_v34 }
0x1462   :  { %v1698_v42 = vpop.permute.xlu1 %1697 }
0x1463   :  { %v1700_v11 = vmul.f32 %v1698_v42, %v1693_v8 }
0x1464   :  { %v1570_v12 = vpop.permute.xlu0 %1569 }
0x1465   :  { %v1572_v13 = vmul.f32 %v1570_v12, %v1565_v40  ;;  %1702 = vrot.lane.b32.xlu1 %v1700_v11, %s2742_s21 }
0x1467   :  { %1574 = vrot.lane.b32.xlu0 %v1572_v13, %s2742_s21 }
0x14d7   :  { %v1703_v16 = vpop.permute.xlu1 %1702 }
0x14d8   :  { %v3191_v17 = vadd.f32 %v1703_v16, %v1695_v14  ;;  %v2608_v16 = vld [vmem:[%s3314_s7 + $0x68] sm:$0xff]  }
0x14d9   :  { %v1575_v19 = vpop.permute.xlu0 %1574 }
0x14da   :  { %2686 = vtanh.f32 %v3191_v17  ;;  %v3195_v21 = vadd.f32 %v1575_v19, %v1567_v18  ;;  %v2609_v18 = vld [vmem:[%s3314_s7 + $0x60] sm:$0xff]  }
0x14dc   :  { %2688 = vtanh.f32 %v3195_v21 }
0x14e7   :  { %v2687_v24 = vpop.eup %2686 }
0x14e8   :  { %1708 = vrot.lane.b32.xlu1 %v2687_v24, %s2741_s20 }
0x14e9   :  { %v2689_v28 = vpop.eup %2688 }
0x14ea   :  { %1580 = vrot.lane.b32.xlu0 %v2689_v28, %s2741_s20 }
0x155a   :  { %v1709_v32 = vpop.permute.xlu1 %1708 }
0x155b   :  { %v1711_v34 = vmul.f32 %v1709_v32, %v1693_v8 }
0x155c   :  { %v1581_v35 = vpop.permute.xlu0 %1580 }
0x155d   :  { %v1712_v25 = vpack.c.bf16 %v1711_v34, %v1711_v34  ;;  %v1583_v36 = vmul.f32 %v1581_v35, %v1565_v40 }
0x155f   :  { %v1584_v4 = vpack.c.bf16 %v1583_v36, %v1583_v36  ;;  %1714 = vrot.lane.b32.xlu1 %v1712_v25, %s2742_s21 }
0x1561   :  { %1590 = vrot.lane.b32.xlu0 %v1584_v4, %s2742_s21 }
0x15d1   :  { %v1715_v43 = vpop.permute.xlu1 %1714 }
0x15d3   :  { %v1591_v27 = vpop.permute.xlu0 %1590 }
0x15d4   :  { %2512 = vmatmul.mubr.msk.bf16.vlgmr.msra.gmra.mxu1 %vm189_vm2, %v1591_v27  ;;  %2536 = vmatmul.mubr.msk.bf16.vlgmr.msra.gmra.mxu0 %vm189_vm2, %v1591_v27 }
0x15d5   :  { %2524 = vmatpush3.bf16.msra.mxu1 %v3215_v38  ;;  %2548 = vmatpush3.bf16.msra.mxu0 %v3147_v46 }
0x15d6   :  { %2525 = vmatprep.subr.bf16.mxu1 %v2738_v1  ;;  %2549 = vmatprep.subr.bf16.mxu0 %v2738_v1 }
0x15d7   :  { %2527 = vmatprep.mubr.msk.bf16.mxu1 %vm2739_vm1, %v2738_v1  ;;  %2551 = vmatprep.mubr.msk.bf16.mxu0 %vm2739_vm1, %v2738_v1 }
0x15d9   :  { %2526 = vmatpush3.bf16.msra.mxu1 %v3228_v33  ;;  %2550 = vmatpush3.bf16.msra.mxu0 %v3160_v26 }
0x15da   :  { %2539 = vmatprep.subr.bf16.mxu1 %v2738_v1  ;;  %2563 = vmatprep.subr.bf16.mxu0 %v2738_v1 }
0x15dc   :  { %2528 = vmatmul.mubr.msk.bf16.vlgmr.msra.gmra.mxu1 %vm189_vm2, %v1715_v43  ;;  %2552 = vmatmul.mubr.msk.bf16.vlgmr.msra.gmra.mxu0 %vm189_vm2, %v1715_v43 }
0x15dd   :  { %2564 = vmatpush3.bf16.msra.mxu0 %v2713_v44  ;;  %2543 = vmatprep.mubr.msk.bf16.mxu1 %vm2739_vm1, %v2738_v1 }
0x15de   :  { %2565 = vmatprep.subr.bf16.mxu0 %v2738_v1  ;;  %2567 = vmatprep.mubr.msk.bf16.mxu0 %vm2739_vm1, %v2738_v1 }
0x15df   :  { %2540 = vmatpush3.bf16.msra.mxu1 %v2608_v16 }
0x15e0   :  { %2541 = vmatprep.subr.bf16.mxu1 %v2738_v1 }
0x15e1   :  { %2566 = vmatpush3.bf16.msra.mxu0 %v2714_v7 }
0x15e3   :  { %2542 = vmatpush3.bf16.msra.mxu1 %v2609_v18 }
0x15e4   :  { %2555 = vmatprep.subr.bf16.mxu1 %v2738_v1 }
0x1694   :  { %v1641_v45 = vpop.f32.mrf.mxu1  ;;  %v1793_v46 = vpop.f32.mrf.mxu0 }
0x1695   :  { %v3248_v26 = vadd.f32 %v1641_v45, %v3176_v51 }
0x1696   :  { %v2513_v48 = vpop.f32.mrf.mxu1  ;;  %v2537_v30 = vpop.f32.mrf.mxu0 }
0x1698   :  { %v1644_v49 = vpop.f32.mrf.mxu1  ;;  %v1796_v2 = vpop.f32.mrf.mxu0 }
0x169a   :  { %v2514_v5 = vpop.f32.mrf.mxu1  ;;  %v2538_v29 = vpop.f32.mrf.mxu0 }
0x169c   :  { %v1753_v20 = vpop.f32.mrf.mxu1  ;;  %v1921_v55 = vpop.f32.mrf.mxu0 }
0x169d   :  { %v1754_v57 = vadd.f32 %v3255_v31, %v1753_v20  ;;  %v1927_v51 = vadd.f32 %v1921_v55, %v152_v54 }
0x169e   :  { %v2529_v58 = vpop.f32.mrf.mxu1  ;;  %v2553_v59 = vpop.f32.mrf.mxu0 }
0x169f   :  { %v1799_v52 = vadd.f32 %v1793_v46, %v1754_v57  ;;  %2690 = vtanh.f32 %v1927_v51  ;;  %v1928_v0 = vmul.f32 0.5, %v1927_v51  ;;  %v2610_v59 = vld [vmem:[%s3314_s7 + $0x78] sm:$0xff]  }
0x16a0   :  { %v1756_v60 = vpop.f32.mrf.mxu1  ;;  %v1924_v61 = vpop.f32.mrf.mxu0 }
0x16a1   :  { %2692 = vtanh.f32 %v1799_v52  ;;  %v1800_v50 = vmul.f32 0.5, %v1799_v52  ;;  %v2611_v52 = vld [vmem:[%s3314_s7 + $0x70] sm:$0xff]   ;;  %s2743_s7 = smov [#allocation3]  }
0x16a2   :  { %v2530_v62 = vpop.f32.mrf.mxu1  ;;  %v2554_v63 = vpop.f32.mrf.mxu0  ;;  %2694 = vtanh.f32 %v1928_v0  ;;  %v2211_v0 = vld [vmem:[%s3315_s8] ss:$0 sm:$0xff]  ;;  %s2140_s2 = sshll.u32 %s2743_s7, 4  ;;  %s2141_s2 = int_to_ptr.vmem [resolvable:$true] %s2140_s2 }
0x16a3   :  { %2696 = vtanh.f32 %v1800_v50  ;;  %p2721_p1 = scmp.lt.s32.totalorder %s2141_s2, %s2141_s2 }
0x16ac   :  { %v2691_v41 = vpop.eup %2690 }
0x16ad   :  { %1935 = vrot.lane.b32.xlu1 %v2691_v41, %s2741_s20 }
0x16ae   :  { %v2693_v56 = vpop.eup %2692 }
0x16af   :  { %1807 = vrot.lane.b32.xlu0 %v2693_v56, %s2741_s20  ;;  %v2695_v15 = vpop.eup %2694 }
0x16b0   :  { %v2697_v53 = vpop.eup %2696  ;;  %v1930_v3 = vmul.f32 0.5, %v2695_v15 }
0x16b1   :  { %v1802_v39 = vmul.f32 0.5, %v2697_v53 }
0x16b2   :  { %v1931_v6 = vadd.f32 0.5, %v1930_v3 }
0x16b3   :  { %v1803_v37 = vadd.f32 0.5, %v1802_v39 }
0x16b4   :  { %v1933_v42 = vmul.f32 %v1931_v6, %v3191_v17 }
0x16b5   :  { %v1805_v12 = vmul.f32 %v1803_v37, %v3195_v21 }
0x171f   :  { %v1936_v47 = vpop.permute.xlu1 %1935 }
0x1720   :  { %v1938_v9 = vmul.f32 %v1936_v47, %v1931_v6 }
0x1721   :  { %v1808_v10 = vpop.permute.xlu0 %1807 }
0x1722   :  { %v1810_v8 = vmul.f32 %v1808_v10, %v1803_v37  ;;  %1940 = vrot.lane.b32.xlu1 %v1938_v9, %s2742_s21 }
0x1724   :  { %1812 = vrot.lane.b32.xlu0 %v1810_v8, %s2742_s21 }
0x1794   :  { %v1941_v11 = vpop.permute.xlu1 %1940 }
0x1795   :  { %v1943_v40 = vadd.f32 %v1941_v11, %v1933_v42 }
0x1796   :  { %v1813_v13 = vpop.permute.xlu0 %1812 }
0x1797   :  { %2698 = vtanh.f32 %v1943_v40  ;;  %v1815_v14 = vadd.f32 %v1813_v13, %v1805_v12 }
0x1799   :  { %2700 = vtanh.f32 %v1815_v14 }
0x17a4   :  { %v2699_v17 = vpop.eup %2698 }
0x17a5   :  { %1946 = vrot.lane.b32.xlu1 %v2699_v17, %s2741_s20 }
0x17a6   :  { %v2701_v19 = vpop.eup %2700 }
0x17a7   :  { %1818 = vrot.lane.b32.xlu0 %v2701_v19, %s2741_s20 }
0x1817   :  { %v1947_v21 = vpop.permute.xlu1 %1946 }
0x1818   :  { %v1949_v22 = vmul.f32 %v1947_v21, %v1931_v6 }
0x1819   :  { %v1819_v23 = vpop.permute.xlu0 %1818 }
0x181a   :  { %v1950_v24 = vpack.c.bf16 %v1949_v22, %v1949_v22  ;;  %v1821_v28 = vmul.f32 %v1819_v23, %v1803_v37 }
0x181c   :  { %v1822_v32 = vpack.c.bf16 %v1821_v28, %v1821_v28  ;;  %1952 = vrot.lane.b32.xlu1 %v1950_v24, %s2742_s21 }
0x181e   :  { %1828 = vrot.lane.b32.xlu0 %v1822_v32, %s2742_s21 }
0x188e   :  { %v1953_v35 = vpop.permute.xlu1 %1952 }
0x1890   :  { %v1829_v34 = vpop.permute.xlu0 %1828 }
0x1891   :  { %2544 = vmatmul.mubr.msk.bf16.vlgmr.msra.gmra.mxu1 %vm189_vm2, %v1829_v34  ;;  %2568 = vmatmul.mubr.msk.bf16.vlgmr.msra.gmra.mxu0 %vm189_vm2, %v1829_v34 }
0x1892   :  { %2556 = vmatpush3.bf16.msra.mxu1 %v3215_v38  ;;  %2559 = vmatprep.mubr.msk.bf16.mxu1 %vm2739_vm1, %v2738_v1 }
0x1893   :  { %2557 = vmatprep.subr.bf16.mxu1 %v2738_v1 }
0x1896   :  { %2558 = vmatpush3.bf16.msra.mxu1 %v3228_v33 }
0x1897   :  { %2571 = vmatprep.subr.bf16.mxu1 %v2738_v1 }
0x1899   :  { %2560 = vmatmul.mubr.msk.bf16.vlgmr.msra.gmra.mxu1 %vm189_vm2, %v1953_v35 }
0x189a   :  { %2575 = vmatprep.mubr.msk.bf16.mxu1 %vm2739_vm1, %v2738_v1  ;;  %2572 = vmatpush3.bf16.msra.mxu1 %v2610_v59 }
0x189b   :  { %2573 = vmatprep.subr.bf16.mxu1 %v2738_v1 }
0x189e   :  { %2574 = vmatpush3.bf16.msra.mxu1 %v2611_v52 }
0x1951   :  { %v1879_v25 = vpop.f32.mrf.mxu1  ;;  %v2031_v36 = vpop.f32.mrf.mxu0 }
0x1952   :  { %v1885_v4 = vadd.f32 %v1879_v25, %v3248_v26 }
0x1953   :  { %v2545_v27 = vpop.f32.mrf.mxu1  ;;  %v2569_v38 = vpop.f32.mrf.mxu0 }
0x1955   :  { %v1882_v43 = vpop.f32.mrf.mxu1  ;;  %v2034_v44 = vpop.f32.mrf.mxu0 }
0x1957   :  { %v2546_v7 = vpop.f32.mrf.mxu1  ;;  %v2570_v45 = vpop.f32.mrf.mxu0 }
0x1959   :  { %v1991_v46 = vpop.f32.mrf.mxu1 }
0x195a   :  { %v1992_v33 = vadd.f32 %v3255_v31, %v1991_v46 }
0x195b   :  { %v2561_v48 = vpop.f32.mrf.mxu1 }
0x195c   :  { %v2037_v30 = vadd.f32 %v2031_v36, %v1992_v33 }
0x195d   :  { %v1994_v49 = vpop.f32.mrf.mxu1 }
0x195e   :  { %2702 = vtanh.f32 %v2037_v30  ;;  %v2038_v29 = vmul.f32 0.5, %v2037_v30 }
0x195f   :  { %v2562_v2 = vpop.f32.mrf.mxu1 }
0x1960   :  { %2704 = vtanh.f32 %v2038_v29 }
0x196b   :  { %v2703_v5 = vpop.eup %2702 }
0x196c   :  { %2045 = vrot.lane.b32.xlu0 %v2703_v5, %s2741_s20 }
0x196d   :  { %v2705_v26 = vpop.eup %2704 }
0x196e   :  { %v2040_v54 = vmul.f32 0.5, %v2705_v26 }
0x1970   :  { %v2041_v20 = vadd.f32 0.5, %v2040_v54 }
0x1972   :  { %v2043_v51 = vmul.f32 %v2041_v20, %v1815_v14 }
0x19de   :  { %v2046_v55 = vpop.permute.xlu0 %2045 }
0x19df   :  { %v2048_v57 = vmul.f32 %v2046_v55, %v2041_v20 }
0x19e1   :  { %2050 = vrot.lane.b32.xlu1 %v2048_v57, %s2742_s21 }
0x1a53   :  { %v2051_v58 = vpop.permute.xlu1 %2050 }
0x1a54   :  { %v2053_v31 = vadd.f32 %v2051_v58, %v2043_v51 }
0x1a56   :  { %2706 = vtanh.f32 %v2053_v31 }
0x1a63   :  { %v2707_v60 = vpop.eup %2706 }
0x1a64   :  { %2056 = vrot.lane.b32.xlu0 %v2707_v60, %s2741_s20  ;;  %s2716_s20 = scalar_lea.vmem %s2141_s2, 32 }
0x1a65   :  { %p2717_p0 = scmp.ne.s32.totalorder %s2141_s2, %s2716_s20  ;;  %p2722_p2 = scmp.lt.s32.totalorder %s2716_s20, %s2716_s20 }
0x1a67   :  { %p2723_p3 = por %p2722_p2, %p2721_p1 }
0x1a69   :  { %p2724_p4 = pnand %p2723_p3, %p2717_p0 }
0x1ad6   :  { %v2057_v61 = vpop.permute.xlu0 %2056 }
0x1ad7   :  { %v2059_v62 = vmul.f32 %v2057_v61, %v2041_v20 }
0x1ad9   :  { %v2060_v63 = vpack.c.bf16 %v2059_v62, %v2059_v62 }
0x1adb   :  { %2066 = vrot.lane.b32.xlu1 %v2060_v63, %s2742_s21 }
0x1b4d   :  { %v2067_v41 = vpop.permute.xlu1 %2066 }
0x1b4e   :  { %2576 = vmatmul.mubr.msk.bf16.vlgmr.msra.gmra.mxu1 %vm189_vm2, %v2067_v41 }
0x1c0e   :  { %v2117_v56 = vpop.f32.mrf.mxu1 }
0x1c0f   :  { %v2123_v1 = vadd.f32 %v2117_v56, %v1885_v4 }
0x1c10   :  { %v2577_v50 = vpop.f32.mrf.mxu1 }
0x1c11   :  { %v2131_v15 = vadd.f32 %v2211_v0, %v2123_v1 }
0x1c12   :  { %v2120_v53 = vpop.f32.mrf.mxu1 }
0x1c13   :  { %2133 = vst.msk [vmem:[#allocation3] sm:$0x3] %vm2132_vm3, %v2131_v15 }
0x1c14   :  { %v2578_v3 = vpop.f32.mrf.mxu1 }
0x1c15   :  { %2727 = shalt.err (!%p2724_p4)
}
0x1c16   :  { %2143 = dma.vmem_to_hbm [thread:$0]  %s2141_s2, 32, %s3316_s9, [#allocation4]  }
0x1c17   :  { %2736 = dma.done.wait [#allocation4], 32  }
0x1c18   :  { %2737 = vsyncadd [#allocation4], 4294967264 }
0x1c19   :  { %2147 = vsyncpa [#allocation4], 1 }

</bundles_post_ra>
